<compile_context>
chip_gen: v7x
topology: tpu7x:2x2x1
jax: 0.10.0
libtpu: 0.0.40
codegen_flags: <defaults>
</compile_context>

<pallas_src>
import functools

import jax
import jax.numpy as jnp
from jax.experimental import pallas as pl
from jax.experimental.pallas import tpu as pltpu


def _round_up(v, m):
    return ((v + m - 1) // m) * m


def _rnn_kernel(x_ref, wfc_ref, bfc_ref,
                wih1_ref, whh1_ref, b1_ref,
                wih2_ref, whh2_ref, b2_ref,
                wout_ref, bout_ref,
                h10_ref, h20_ref,
                out_ref, h1_ref, h2_ref,
                *, t_chunk, t_real, t_pad):
    """One (batch block, time chunk): fc+LeakyReLU+residual, 2 tanh-RNN layers, per-step output proj."""
    tc = pl.program_id(1)
    Bb = h1_ref.shape[0]
    H = h1_ref.shape[1]
    Np = out_ref.shape[2]

    # h1_ref / h2_ref blocks are resident across the serial t-chunk axis and
    # double as the carried recurrent state (init on the first chunk).
    @pl.when(tc == 0)
    def _():
        h1_ref[...] = h10_ref[...]
        h2_ref[...] = h20_ref[...]

    # --- concat_input_fc + LeakyReLU + residual (batched over the chunk) -----
    X = x_ref[...]                                               # (Tc, Bb, D) f32
    fc = jnp.einsum('tbd,de->tbe', X.astype(jnp.bfloat16), wfc_ref[...],
                    preferred_element_type=jnp.float32) + bfc_ref[...]
    fc = jnp.where(fc >= 0.0, fc, 0.01 * fc)                     # LeakyReLU(0.01)
    Xres = fc + X                                                # (Tc, Bb, D) f32

    # --- layer-1 input projection hoisted out of the serial time loop --------
    pre1 = jnp.einsum('tbd,dh->tbh', Xres.astype(jnp.bfloat16), wih1_ref[...],
                      preferred_element_type=jnp.float32) + b1_ref[...]   # (Tc, Bb, H) f32

    # --- hoisted loop invariants ---------------------------------------------
    whh1 = whh1_ref[...]                                         # (H, H)     bf16
    wih2 = wih2_ref[...]                                         # (H, H)     bf16
    whh2 = whh2_ref[...]                                         # (H, H)     bf16
    wout = wout_ref[...]                                         # (H, Np)    bf16
    b2b = jnp.broadcast_to(b2_ref[...], (Bb, H))                 # broadcast once
    boutb = jnp.broadcast_to(bout_ref[...], (Bb, Np))            # broadcast once

    # --- two stacked vanilla (tanh) RNN layers, unrolled over the chunk ------
    # bf16 matmuls with f32 accumulation; tanh / state path stays f32.
    h1 = h1_ref[...]
    h2 = h2_ref[...]
    h1b = h1.astype(jnp.bfloat16)
    h2b = h2.astype(jnp.bfloat16)
    needs_mask = (t_pad != t_real)                               # static

    for t in range(t_chunk):                                     # static unroll
        h1n = jnp.tanh(pre1[t]
                       + jnp.dot(h1b, whh1, preferred_element_type=jnp.float32))
        h1nb = h1n.astype(jnp.bfloat16)
        h2n = jnp.tanh(jnp.dot(h1nb, wih2, preferred_element_type=jnp.float32)
                       + jnp.dot(h2b, whh2, preferred_element_type=jnp.float32)
                       + b2b)
        h2nb = h2n.astype(jnp.bfloat16)

        if needs_mask:
            # only advance the state for real (non-padded) time steps
            keep = (tc * t_chunk + t) < t_real
            h1 = jnp.where(keep, h1n, h1)
            h1b = jnp.where(keep, h1nb, h1b)
            h2 = jnp.where(keep, h2n, h2)
            h2b = jnp.where(keep, h2nb, h2b)
        else:
            h1, h1b, h2, h2b = h1n, h1nb, h2n, h2nb

        # per-step output projection: independent of the next recurrence step,
        # lane-dense full-tile store (Np is a multiple of 128).
        out_ref[t] = jnp.dot(h2nb, wout,
                             preferred_element_type=jnp.float32) + boutb

    h1_ref[...] = h1
    h2_ref[...] = h2


def prepare_kernel_params(params):
    """One-time (outside jit) weight transposes, bf16 casts, bias fusion, lane padding."""
    E = params['embedding'].shape[1]
    D = E + 2
    H = params['whh1'].shape[0]
    N = params['wout'].shape[0]
    N_pad = _round_up(N, 128)

    wout_p = jnp.zeros((H, N_pad), jnp.bfloat16).at[:, :N].set(
        params['wout'].T.astype(jnp.bfloat16))
    bout_p = jnp.zeros((1, N_pad), jnp.float32).at[:, :N].set(
        params['bout'].reshape(1, N).astype(jnp.float32))

    return {
        'embedding': params['embedding'].astype(jnp.float32),            # (N, E)
        'wfc': params['wfc'].T.astype(jnp.bfloat16),                     # (D, D)
        'bfc': params['bfc'].reshape(1, D).astype(jnp.float32),
        'wih1': params['wih1'].T.astype(jnp.bfloat16),                   # (D, H)
        'whh1': params['whh1'].T.astype(jnp.bfloat16),                   # (H, H)
        'b1': (params['bih1'] + params['bhh1']).reshape(1, H).astype(jnp.float32),
        'wih2': params['wih2'].T.astype(jnp.bfloat16),                   # (H, H)
        'whh2': params['whh2'].T.astype(jnp.bfloat16),                   # (H, H)
        'b2': (params['bih2'] + params['bhh2']).reshape(1, H).astype(jnp.float32),
        'wout': wout_p,                                                  # (H, N_pad)
        'bout': bout_p,                                                  # (1, N_pad)
    }


def deepbeats_forward(x, y_prev, prep, init_hidden=None):
    """x: (B, T, 2) f32; y_prev: (B, T) int32.  Returns (logits (B,T,N), (h1, h2))."""
    B, T, _ = x.shape
    embed = prep['embedding']
    N, E = embed.shape
    D = E + 2
    H = prep['whh1'].shape[0]
    N_pad = prep['wout'].shape[1]

    # glue: embedding gather + ConcatPrev, then time-major (T, B, D).
    # TODO(synk): optionally scalar-prefetch y_prev and gather embedding rows
    # in-kernel to skip these HBM intermediates (modest win at D=18).
    y_emb = jnp.take(embed, y_prev, axis=0)                       # (B, T, E)
    X = jnp.concatenate([x.astype(jnp.float32), y_emb], axis=-1)  # (B, T, D)
    X = jnp.transpose(X, (1, 0, 2))                               # (T, B, D)

    # --- blocking: T chunked on a serial axis, batch padded to sublanes ------
    T_CHUNK = T if T <= 16 else 16
    T_pad = _round_up(T, T_CHUNK)
    B8 = _round_up(B, 8)
    if B8 <= 8:
        B_BLK = 8
    else:
        # >=2 batch blocks when B >= 16 so the parallel axis can shard across
        # v7x's two TensorCores; capped at 64 rows.  (On 1-TC v5e/v6e a larger
        # block would amortize per-step overhead further; 64 is a safe middle.)
        B_BLK = min(64, _round_up(pl.cdiv(B8, 2), 8))
    B_pad = _round_up(B, B_BLK)

    if T_pad != T or B_pad != B:
        X = jnp.pad(X, ((0, T_pad - T), (0, B_pad - B), (0, 0)))

    if init_hidden is None:
        h1_0 = jnp.zeros((B_pad, H), jnp.float32)
        h2_0 = jnp.zeros((B_pad, H), jnp.float32)
    else:
        h1_0 = init_hidden[0].reshape(B, H).astype(jnp.float32)
        h2_0 = init_hidden[1].reshape(B, H).astype(jnp.float32)
        if B_pad != B:
            h1_0 = jnp.pad(h1_0, ((0, B_pad - B), (0, 0)))
            h2_0 = jnp.pad(h2_0, ((0, B_pad - B), (0, 0)))

    num_b = B_pad // B_BLK
    num_t = T_pad // T_CHUNK

    kernel = functools.partial(_rnn_kernel, t_chunk=T_CHUNK, t_real=T, t_pad=T_pad)

    def w_spec(shape):  # weights: same block for every grid point
        return pl.BlockSpec(shape, lambda b, t: (0, 0))

    # per-call VMEM budget: double-buffered X / logits blocks + states + weights
    x_blk = T_CHUNK * B_BLK * D * 4
    out_blk = T_CHUNK * B_BLK * N_pad * 4
    h_blk = B_BLK * H * 4
    w_bytes = (D * D + D * H + 3 * H * H + H * N_pad) * 2 + (D + 2 * H + N_pad) * 4
    est = 2 * (x_blk + out_blk) + 8 * h_blk + 2 * w_bytes
    vmem_limit = int(min(64 * 1024 * 1024, max(8 * 1024 * 1024, 4 * est)))

    out_tm, h1_f, h2_f = pl.pallas_call(
        kernel,
        out_shape=(
            jax.ShapeDtypeStruct((T_pad, B_pad, N_pad), jnp.float32),
            jax.ShapeDtypeStruct((B_pad, H), jnp.float32),
            jax.ShapeDtypeStruct((B_pad, H), jnp.float32),
        ),
        grid=(num_b, num_t),
        in_specs=[
            pl.BlockSpec((T_CHUNK, B_BLK, D), lambda b, t: (t, b, 0)),   # X (time-major)
            w_spec((D, D)),        # wfc
            w_spec((1, D)),        # bfc
            w_spec((D, H)),        # wih1
            w_spec((H, H)),        # whh1
            w_spec((1, H)),        # b1
            w_spec((H, H)),        # wih2
            w_spec((H, H)),        # whh2
            w_spec((1, H)),        # b2
            w_spec((H, N_pad)),    # wout (lane-padded)
            w_spec((1, N_pad)),    # bout (lane-padded)
            pl.BlockSpec((B_BLK, H), lambda b, t: (b, 0)),               # h1_0
            pl.BlockSpec((B_BLK, H), lambda b, t: (b, 0)),               # h2_0
        ],
        out_specs=(
            pl.BlockSpec((T_CHUNK, B_BLK, N_pad), lambda b, t: (t, b, 0)),
            pl.BlockSpec((B_BLK, H), lambda b, t: (b, 0)),               # resident carry
            pl.BlockSpec((B_BLK, H), lambda b, t: (b, 0)),               # resident carry
        ),
        compiler_params=pltpu.CompilerParams(
            dimension_semantics=("parallel", "arbitrary"),
            vmem_limit_bytes=vmem_limit),
    )(X, prep['wfc'], prep['bfc'], prep['wih1'], prep['whh1'], prep['b1'],
      prep['wih2'], prep['whh2'], prep['b2'], prep['wout'], prep['bout'],
      h1_0, h2_0)

    # slice padding + back to batch-major; XLA fuses the slice and transpose
    # into a single copy of the logits tensor.
    logits = jnp.transpose(out_tm[:T, :B, :N], (1, 0, 2))         # (B, T, N)
    # match PyTorch nn.RNN hidden shape (num_layers=1, B, H)
    return logits, (h1_f[:B].reshape(1, B, H), h2_f[:B].reshape(1, B, H))


def init_params(key, num_notes, embed_size, hidden_dim):
    D = embed_size + 2
    H = hidden_dim
    ks = jax.random.split(key, 12)

    def xavier(k, shape):  # nn.init.xavier_uniform_ on (out, in)
        fan_out, fan_in = shape
        a = jnp.sqrt(6.0 / (fan_in + fan_out))
        return jax.random.uniform(k, shape, jnp.float32, -a, a)

    def rnn_u(k, shape, hid):  # PyTorch nn.RNN default: U(-1/sqrt(H), 1/sqrt(H))
        a = 1.0 / jnp.sqrt(hid)
        return jax.random.uniform(k, shape, jnp.float32, -a, a)

    return {
        'embedding': jax.random.normal(ks[0], (num_notes, embed_size), jnp.float32),
        'wfc': xavier(ks[1], (D, D)),
        'bfc': jnp.zeros((D,), jnp.float32),
        'wih1': rnn_u(ks[2], (H, D), H),
        'whh1': rnn_u(ks[3], (H, H), H),
        'bih1': rnn_u(ks[4], (H,), H),
        'bhh1': rnn_u(ks[5], (H,), H),
        'wih2': rnn_u(ks[6], (H, H), H),
        'whh2': rnn_u(ks[7], (H, H), H),
        'bih2': rnn_u(ks[8], (H,), H),
        'bhh2': rnn_u(ks[9], (H,), H),
        'wout': xavier(ks[10], (num_notes, H)),
        'bout': jnp.zeros((num_notes,), jnp.float32),
    }


if __name__ == "__main__":
    num_notes, embed_size, hidden_dim = 64, 16, 32
    batch, seq = 2, 8

    key = jax.random.PRNGKey(0)
    kp, kx, ky = jax.random.split(key, 3)

    params = init_params(kp, num_notes, embed_size, hidden_dim)
    prep = prepare_kernel_params(params)                         # once, outside jit

    x = jax.random.normal(kx, (batch, seq, 2), jnp.float32)      # duration features
    y_prev = jax.random.randint(ky, (batch, seq), 0, num_notes, jnp.int32)

    fwd = jax.jit(deepbeats_forward)
    logits, (h1, h2) = fwd(x, y_prev, prep)
    jax.block_until_ready((logits, h1, h2))

    assert logits.shape == (batch, seq, num_notes)
    assert h1.shape == (1, batch, hidden_dim) and h2.shape == (1, batch, hidden_dim)
    print("KERNEL_OK")
</pallas_src>

<mosaic_0001>
module attributes {stable_mosaic.version = 11 : i64} {
  func.func @_rnn_kernel(%arg0: i32, %arg1: i32, %arg2: memref<8x8x18xf32, #tpu.memory_space<vmem>>, %arg3: memref<18x18xbf16, #tpu.memory_space<vmem>>, %arg4: memref<1x18xf32, #tpu.memory_space<vmem>>, %arg5: memref<18x32xbf16, #tpu.memory_space<vmem>>, %arg6: memref<32x32xbf16, #tpu.memory_space<vmem>>, %arg7: memref<1x32xf32, #tpu.memory_space<vmem>>, %arg8: memref<32x32xbf16, #tpu.memory_space<vmem>>, %arg9: memref<32x32xbf16, #tpu.memory_space<vmem>>, %arg10: memref<1x32xf32, #tpu.memory_space<vmem>>, %arg11: memref<32x128xbf16, #tpu.memory_space<vmem>>, %arg12: memref<1x128xf32, #tpu.memory_space<vmem>>, %arg13: memref<8x32xf32, #tpu.memory_space<vmem>>, %arg14: memref<8x32xf32, #tpu.memory_space<vmem>>, %arg15: memref<8x8x128xf32, #tpu.memory_space<vmem>>, %arg16: memref<8x32xf32, #tpu.memory_space<vmem>>, %arg17: memref<8x32xf32, #tpu.memory_space<vmem>>) attributes {dimension_semantics = [#tpu.dimension_semantics<parallel>, #tpu.dimension_semantics<arbitrary>], iteration_bounds = array<i64: 1, 1>, scalar_prefetch = 0 : i64, scratch_operands = 0 : i64, tpu.core_type = #tpu.core_type<tc>, window_params = [{transform_indices = @transform_0, window_bounds = array<i64: 8, 8, 18>}, {pipeline_mode = #tpu.pipeline_mode<synchronous>, transform_indices = @transform_1, window_bounds = array<i64: 18, 18>}, {pipeline_mode = #tpu.pipeline_mode<synchronous>, transform_indices = @transform_2, window_bounds = array<i64: 1, 18>}, {pipeline_mode = #tpu.pipeline_mode<synchronous>, transform_indices = @transform_3, window_bounds = array<i64: 18, 32>}, {pipeline_mode = #tpu.pipeline_mode<synchronous>, transform_indices = @transform_4, window_bounds = array<i64: 32, 32>}, {pipeline_mode = #tpu.pipeline_mode<synchronous>, transform_indices = @transform_5, window_bounds = array<i64: 1, 32>}, {pipeline_mode = #tpu.pipeline_mode<synchronous>, transform_indices = @transform_6, window_bounds = array<i64: 32, 32>}, {pipeline_mode = #tpu.pipeline_mode<synchronous>, transform_indices = @transform_7, window_bounds = array<i64: 32, 32>}, {pipeline_mode = #tpu.pipeline_mode<synchronous>, transform_indices = @transform_8, window_bounds = array<i64: 1, 32>}, {pipeline_mode = #tpu.pipeline_mode<synchronous>, transform_indices = @transform_9, window_bounds = array<i64: 32, 128>}, {pipeline_mode = #tpu.pipeline_mode<synchronous>, transform_indices = @transform_10, window_bounds = array<i64: 1, 128>}, {transform_indices = @transform_11, window_bounds = array<i64: 8, 32>}, {transform_indices = @transform_12, window_bounds = array<i64: 8, 32>}, {transform_indices = @transform_13, window_bounds = array<i64: 8, 8, 128>}, {transform_indices = @transform_14, window_bounds = array<i64: 8, 32>}, {transform_indices = @transform_15, window_bounds = array<i64: 8, 32>}]} {
    %c0_i32 = arith.constant 0 : i32
    %0 = arith.cmpi eq, %arg1, %c0_i32 : i32
    %1 = arith.extui %0 : i1 to i32
    %c0_i32_0 = arith.constant 0 : i32
    %2 = arith.cmpi ne, %1, %c0_i32_0 : i32
    scf.if %2 {
      %c0_83 = arith.constant 0 : index
      %c0_84 = arith.constant 0 : index
      %176 = vector.load %arg13[%c0_83, %c0_84] : memref<8x32xf32, #tpu.memory_space<vmem>>, vector<8x32xf32>
      %c0_85 = arith.constant 0 : index
      %c0_86 = arith.constant 0 : index
      %177 = vector.load %arg16[%c0_85, %c0_86] : memref<8x32xf32, #tpu.memory_space<vmem>>, vector<8x32xf32>
      tpu.vector_store %arg16[%c0_85, %c0_86], %176 {strides = array<i32>} : memref<8x32xf32, #tpu.memory_space<vmem>>, vector<8x32xf32>,
      %c0_87 = arith.constant 0 : index
      %c0_88 = arith.constant 0 : index
      %178 = vector.load %arg14[%c0_87, %c0_88] : memref<8x32xf32, #tpu.memory_space<vmem>>, vector<8x32xf32>
      %c0_89 = arith.constant 0 : index
      %c0_90 = arith.constant 0 : index
      %179 = vector.load %arg17[%c0_89, %c0_90] : memref<8x32xf32, #tpu.memory_space<vmem>>, vector<8x32xf32>
      tpu.vector_store %arg17[%c0_89, %c0_90], %178 {strides = array<i32>} : memref<8x32xf32, #tpu.memory_space<vmem>>, vector<8x32xf32>,
    } else {
    }
    %c0 = arith.constant 0 : index
    %c0_1 = arith.constant 0 : index
    %c0_2 = arith.constant 0 : index
    %3 = vector.load %arg2[%c0, %c0_1, %c0_2] : memref<8x8x18xf32, #tpu.memory_space<vmem>>, vector<8x8x18xf32>
    %4 = arith.truncf %3 : vector<8x8x18xf32> to vector<8x8x18xbf16>
    %c0_3 = arith.constant 0 : index
    %c0_4 = arith.constant 0 : index
    %5 = vector.load %arg3[%c0_3, %c0_4] : memref<18x18xbf16, #tpu.memory_space<vmem>>, vector<18x18xbf16>
    "tpu.trace_start"() <{level = 10 : i32, message = "tbd,de->tbe"}> : () -> ()
    %cst = arith.constant dense<0.000000e+00> : vector<8x8x18xf32>
    %6 = tpu.matmul %4, %5, %cst {dimension_numbers = #tpu.dot_dimension_numbers<[2], [0], [0, 1], [1], [0, 0, 0, 1, 1, 1], [], []>} : vector<8x8x18xbf16>, vector<18x18xbf16>, vector<8x8x18xf32> -> vector<8x8x18xf32>
    "tpu.trace_stop"() : () -> ()
    %c0_5 = arith.constant 0 : index
    %c0_6 = arith.constant 0 : index
    %7 = vector.load %arg4[%c0_5, %c0_6] : memref<1x18xf32, #tpu.memory_space<vmem>>, vector<1x18xf32>
    %8 = vector.shape_cast %7 : vector<1x18xf32> to vector<1x1x18xf32>
    %9 = vector.broadcast %8 : vector<1x1x18xf32> to vector<8x8x18xf32>
    %10 = arith.addf %6, %9 : vector<8x8x18xf32>
    %cst_7 = arith.constant 0.000000e+00 : f32
    %11 = vector.broadcast %cst_7 : f32 to vector<8x8x18xf32>
    %12 = arith.cmpf oge, %10, %11 : vector<8x8x18xf32>
    %cst_8 = arith.constant 0.00999999977 : f32
    %13 = vector.broadcast %cst_8 : f32 to vector<8x8x18xf32>
    %14 = arith.mulf %13, %10 : vector<8x8x18xf32>
    %15 = arith.select %12, %10, %14 : vector<8x8x18xi1>, vector<8x8x18xf32>
    %16 = arith.addf %15, %3 : vector<8x8x18xf32>
    %17 = arith.truncf %16 : vector<8x8x18xf32> to vector<8x8x18xbf16>
    %c0_9 = arith.constant 0 : index
    %c0_10 = arith.constant 0 : index
    %18 = vector.load %arg5[%c0_9, %c0_10] : memref<18x32xbf16, #tpu.memory_space<vmem>>, vector<18x32xbf16>
    "tpu.trace_start"() <{level = 10 : i32, message = "tbd,dh->tbh"}> : () -> ()
    %cst_11 = arith.constant dense<0.000000e+00> : vector<8x8x32xf32>
    %19 = tpu.matmul %17, %18, %cst_11 {dimension_numbers = #tpu.dot_dimension_numbers<[2], [0], [0, 1], [1], [0, 0, 0, 1, 1, 1], [], []>} : vector<8x8x18xbf16>, vector<18x32xbf16>, vector<8x8x32xf32> -> vector<8x8x32xf32>
    "tpu.trace_stop"() : () -> ()
    %c0_12 = arith.constant 0 : index
    %c0_13 = arith.constant 0 : index
    %20 = vector.load %arg7[%c0_12, %c0_13] : memref<1x32xf32, #tpu.memory_space<vmem>>, vector<1x32xf32>
    %21 = vector.shape_cast %20 : vector<1x32xf32> to vector<1x1x32xf32>
    %22 = vector.broadcast %21 : vector<1x1x32xf32> to vector<8x8x32xf32>
    %23 = arith.addf %19, %22 : vector<8x8x32xf32>
    %c0_14 = arith.constant 0 : index
    %c0_15 = arith.constant 0 : index
    %24 = vector.load %arg6[%c0_14, %c0_15] : memref<32x32xbf16, #tpu.memory_space<vmem>>, vector<32x32xbf16>
    %c0_16 = arith.constant 0 : index
    %c0_17 = arith.constant 0 : index
    %25 = vector.load %arg8[%c0_16, %c0_17] : memref<32x32xbf16, #tpu.memory_space<vmem>>, vector<32x32xbf16>
    %c0_18 = arith.constant 0 : index
    %c0_19 = arith.constant 0 : index
    %26 = vector.load %arg9[%c0_18, %c0_19] : memref<32x32xbf16, #tpu.memory_space<vmem>>, vector<32x32xbf16>
    %c0_20 = arith.constant 0 : index
    %c0_21 = arith.constant 0 : index
    %27 = vector.load %arg11[%c0_20, %c0_21] : memref<32x128xbf16, #tpu.memory_space<vmem>>, vector<32x128xbf16>
    %c0_22 = arith.constant 0 : index
    %c0_23 = arith.constant 0 : index
    %28 = vector.load %arg10[%c0_22, %c0_23] : memref<1x32xf32, #tpu.memory_space<vmem>>, vector<1x32xf32>
    %29 = vector.shape_cast %28 : vector<1x32xf32> to vector<1x32xf32>
    %30 = vector.broadcast %29 : vector<1x32xf32> to vector<8x32xf32>
    %c0_24 = arith.constant 0 : index
    %c0_25 = arith.constant 0 : index
    %31 = vector.load %arg12[%c0_24, %c0_25] : memref<1x128xf32, #tpu.memory_space<vmem>>, vector<1x128xf32>
    %32 = vector.shape_cast %31 : vector<1x128xf32> to vector<1x128xf32>
    %33 = vector.broadcast %32 : vector<1x128xf32> to vector<8x128xf32>
    %c0_26 = arith.constant 0 : index
    %c0_27 = arith.constant 0 : index
    %34 = vector.load %arg16[%c0_26, %c0_27] : memref<8x32xf32, #tpu.memory_space<vmem>>, vector<8x32xf32>
    %c0_28 = arith.constant 0 : index
    %c0_29 = arith.constant 0 : index
    %35 = vector.load %arg17[%c0_28, %c0_29] : memref<8x32xf32, #tpu.memory_space<vmem>>, vector<8x32xf32>
    %36 = arith.truncf %34 : vector<8x32xf32> to vector<8x32xbf16>
    %37 = arith.truncf %35 : vector<8x32xf32> to vector<8x32xbf16>
    %38 = vector.extract_strided_slice %23 {offsets = [0, 0, 0], sizes = [1, 8, 32], strides = [1, 1, 1]} : vector<8x8x32xf32> to vector<1x8x32xf32>
    %39 = vector.shape_cast %38 : vector<1x8x32xf32> to vector<8x32xf32>
    %cst_30 = arith.constant dense<0.000000e+00> : vector<8x32xf32>
    %40 = tpu.matmul %36, %24, %cst_30 {dimension_numbers = #tpu.dot_dimension_numbers<[1], [0], [0], [1], [0, 0, 1, 1], [], []>} : vector<8x32xbf16>, vector<32x32xbf16>, vector<8x32xf32> -> vector<8x32xf32>
    %41 = arith.addf %39, %40 : vector<8x32xf32>
    %42 = math.tanh %41 : vector<8x32xf32>
    %43 = arith.truncf %42 : vector<8x32xf32> to vector<8x32xbf16>
    %cst_31 = arith.constant dense<0.000000e+00> : vector<8x32xf32>
    %44 = tpu.matmul %43, %25, %cst_31 {dimension_numbers = #tpu.dot_dimension_numbers<[1], [0], [0], [1], [0, 0, 1, 1], [], []>} : vector<8x32xbf16>, vector<32x32xbf16>, vector<8x32xf32> -> vector<8x32xf32>
    %cst_32 = arith.constant dense<0.000000e+00> : vector<8x32xf32>
    %45 = tpu.matmul %37, %26, %cst_32 {dimension_numbers = #tpu.dot_dimension_numbers<[1], [0], [0], [1], [0, 0, 1, 1], [], []>} : vector<8x32xbf16>, vector<32x32xbf16>, vector<8x32xf32> -> vector<8x32xf32>
    %46 = arith.addf %44, %45 : vector<8x32xf32>
    %47 = arith.addf %46, %30 : vector<8x32xf32>
    %48 = math.tanh %47 : vector<8x32xf32>
    %49 = arith.truncf %48 : vector<8x32xf32> to vector<8x32xbf16>
    %cst_33 = arith.constant dense<0.000000e+00> : vector<8x128xf32>
    %50 = tpu.matmul %49, %27, %cst_33 {dimension_numbers = #tpu.dot_dimension_numbers<[1], [0], [0], [1], [0, 0, 1, 1], [], []>} : vector<8x32xbf16>, vector<32x128xbf16>, vector<8x128xf32> -> vector<8x128xf32>
    %51 = arith.addf %50, %33 : vector<8x128xf32>
    %c0_34 = arith.constant 0 : index
    %c0_35 = arith.constant 0 : index
    %c0_36 = arith.constant 0 : index
    %52 = vector.load %arg15[%c0_34, %c0_35, %c0_36] : memref<8x8x128xf32, #tpu.memory_space<vmem>>, vector<1x8x128xf32>
    %53 = vector.shape_cast %52 : vector<1x8x128xf32> to vector<8x128xf32>
    %54 = vector.shape_cast %51 : vector<8x128xf32> to vector<1x8x128xf32>
    tpu.vector_store %arg15[%c0_34, %c0_35, %c0_36], %54 {strides = array<i32>} : memref<8x8x128xf32, #tpu.memory_space<vmem>>, vector<1x8x128xf32>,
    %55 = vector.extract_strided_slice %23 {offsets = [1, 0, 0], sizes = [1, 8, 32], strides = [1, 1, 1]} : vector<8x8x32xf32> to vector<1x8x32xf32>
    %56 = vector.shape_cast %55 : vector<1x8x32xf32> to vector<8x32xf32>
    %cst_37 = arith.constant dense<0.000000e+00> : vector<8x32xf32>
    %57 = tpu.matmul %43, %24, %cst_37 {dimension_numbers = #tpu.dot_dimension_numbers<[1], [0], [0], [1], [0, 0, 1, 1], [], []>} : vector<8x32xbf16>, vector<32x32xbf16>, vector<8x32xf32> -> vector<8x32xf32>
    %58 = arith.addf %56, %57 : vector<8x32xf32>
    %59 = math.tanh %58 : vector<8x32xf32>
    %60 = arith.truncf %59 : vector<8x32xf32> to vector<8x32xbf16>
    %cst_38 = arith.constant dense<0.000000e+00> : vector<8x32xf32>
    %61 = tpu.matmul %60, %25, %cst_38 {dimension_numbers = #tpu.dot_dimension_numbers<[1], [0], [0], [1], [0, 0, 1, 1], [], []>} : vector<8x32xbf16>, vector<32x32xbf16>, vector<8x32xf32> -> vector<8x32xf32>
    %cst_39 = arith.constant dense<0.000000e+00> : vector<8x32xf32>
    %62 = tpu.matmul %49, %26, %cst_39 {dimension_numbers = #tpu.dot_dimension_numbers<[1], [0], [0], [1], [0, 0, 1, 1], [], []>} : vector<8x32xbf16>, vector<32x32xbf16>, vector<8x32xf32> -> vector<8x32xf32>
    %63 = arith.addf %61, %62 : vector<8x32xf32>
    %64 = arith.addf %63, %30 : vector<8x32xf32>
    %65 = math.tanh %64 : vector<8x32xf32>
    %66 = arith.truncf %65 : vector<8x32xf32> to vector<8x32xbf16>
    %cst_40 = arith.constant dense<0.000000e+00> : vector<8x128xf32>
    %67 = tpu.matmul %66, %27, %cst_40 {dimension_numbers = #tpu.dot_dimension_numbers<[1], [0], [0], [1], [0, 0, 1, 1], [], []>} : vector<8x32xbf16>, vector<32x128xbf16>, vector<8x128xf32> -> vector<8x128xf32>
    %68 = arith.addf %67, %33 : vector<8x128xf32>
    %c1 = arith.constant 1 : index
    %c0_41 = arith.constant 0 : index
    %c0_42 = arith.constant 0 : index
    %69 = vector.load %arg15[%c1, %c0_41, %c0_42] : memref<8x8x128xf32, #tpu.memory_space<vmem>>, vector<1x8x128xf32>
    %70 = vector.shape_cast %69 : vector<1x8x128xf32> to vector<8x128xf32>
    %71 = vector.shape_cast %68 : vector<8x128xf32> to vector<1x8x128xf32>
    tpu.vector_store %arg15[%c1, %c0_41, %c0_42], %71 {strides = array<i32>} : memref<8x8x128xf32, #tpu.memory_space<vmem>>, vector<1x8x128xf32>,
    %72 = vector.extract_strided_slice %23 {offsets = [2, 0, 0], sizes = [1, 8, 32], strides = [1, 1, 1]} : vector<8x8x32xf32> to vector<1x8x32xf32>
    %73 = vector.shape_cast %72 : vector<1x8x32xf32> to vector<8x32xf32>
    %cst_43 = arith.constant dense<0.000000e+00> : vector<8x32xf32>
    %74 = tpu.matmul %60, %24, %cst_43 {dimension_numbers = #tpu.dot_dimension_numbers<[1], [0], [0], [1], [0, 0, 1, 1], [], []>} : vector<8x32xbf16>, vector<32x32xbf16>, vector<8x32xf32> -> vector<8x32xf32>
    %75 = arith.addf %73, %74 : vector<8x32xf32>
    %76 = math.tanh %75 : vector<8x32xf32>
    %77 = arith.truncf %76 : vector<8x32xf32> to vector<8x32xbf16>
    %cst_44 = arith.constant dense<0.000000e+00> : vector<8x32xf32>
    %78 = tpu.matmul %77, %25, %cst_44 {dimension_numbers = #tpu.dot_dimension_numbers<[1], [0], [0], [1], [0, 0, 1, 1], [], []>} : vector<8x32xbf16>, vector<32x32xbf16>, vector<8x32xf32> -> vector<8x32xf32>
    %cst_45 = arith.constant dense<0.000000e+00> : vector<8x32xf32>
    %79 = tpu.matmul %66, %26, %cst_45 {dimension_numbers = #tpu.dot_dimension_numbers<[1], [0], [0], [1], [0, 0, 1, 1], [], []>} : vector<8x32xbf16>, vector<32x32xbf16>, vector<8x32xf32> -> vector<8x32xf32>
    %80 = arith.addf %78, %79 : vector<8x32xf32>
    %81 = arith.addf %80, %30 : vector<8x32xf32>
    %82 = math.tanh %81 : vector<8x32xf32>
    %83 = arith.truncf %82 : vector<8x32xf32> to vector<8x32xbf16>
    %cst_46 = arith.constant dense<0.000000e+00> : vector<8x128xf32>
    %84 = tpu.matmul %83, %27, %cst_46 {dimension_numbers = #tpu.dot_dimension_numbers<[1], [0], [0], [1], [0, 0, 1, 1], [], []>} : vector<8x32xbf16>, vector<32x128xbf16>, vector<8x128xf32> -> vector<8x128xf32>
    %85 = arith.addf %84, %33 : vector<8x128xf32>
    %c2 = arith.constant 2 : index
    %c0_47 = arith.constant 0 : index
    %c0_48 = arith.constant 0 : index
    %86 = vector.load %arg15[%c2, %c0_47, %c0_48] : memref<8x8x128xf32, #tpu.memory_space<vmem>>, vector<1x8x128xf32>
    %87 = vector.shape_cast %86 : vector<1x8x128xf32> to vector<8x128xf32>
    %88 = vector.shape_cast %85 : vector<8x128xf32> to vector<1x8x128xf32>
    tpu.vector_store %arg15[%c2, %c0_47, %c0_48], %88 {strides = array<i32>} : memref<8x8x128xf32, #tpu.memory_space<vmem>>, vector<1x8x128xf32>,
    %89 = vector.extract_strided_slice %23 {offsets = [3, 0, 0], sizes = [1, 8, 32], strides = [1, 1, 1]} : vector<8x8x32xf32> to vector<1x8x32xf32>
    %90 = vector.shape_cast %89 : vector<1x8x32xf32> to vector<8x32xf32>
    %cst_49 = arith.constant dense<0.000000e+00> : vector<8x32xf32>
    %91 = tpu.matmul %77, %24, %cst_49 {dimension_numbers = #tpu.dot_dimension_numbers<[1], [0], [0], [1], [0, 0, 1, 1], [], []>} : vector<8x32xbf16>, vector<32x32xbf16>, vector<8x32xf32> -> vector<8x32xf32>
    %92 = arith.addf %90, %91 : vector<8x32xf32>
    %93 = math.tanh %92 : vector<8x32xf32>
    %94 = arith.truncf %93 : vector<8x32xf32> to vector<8x32xbf16>
    %cst_50 = arith.constant dense<0.000000e+00> : vector<8x32xf32>
    %95 = tpu.matmul %94, %25, %cst_50 {dimension_numbers = #tpu.dot_dimension_numbers<[1], [0], [0], [1], [0, 0, 1, 1], [], []>} : vector<8x32xbf16>, vector<32x32xbf16>, vector<8x32xf32> -> vector<8x32xf32>
    %cst_51 = arith.constant dense<0.000000e+00> : vector<8x32xf32>
    %96 = tpu.matmul %83, %26, %cst_51 {dimension_numbers = #tpu.dot_dimension_numbers<[1], [0], [0], [1], [0, 0, 1, 1], [], []>} : vector<8x32xbf16>, vector<32x32xbf16>, vector<8x32xf32> -> vector<8x32xf32>
    %97 = arith.addf %95, %96 : vector<8x32xf32>
    %98 = arith.addf %97, %30 : vector<8x32xf32>
    %99 = math.tanh %98 : vector<8x32xf32>
    %100 = arith.truncf %99 : vector<8x32xf32> to vector<8x32xbf16>
    %cst_52 = arith.constant dense<0.000000e+00> : vector<8x128xf32>
    %101 = tpu.matmul %100, %27, %cst_52 {dimension_numbers = #tpu.dot_dimension_numbers<[1], [0], [0], [1], [0, 0, 1, 1], [], []>} : vector<8x32xbf16>, vector<32x128xbf16>, vector<8x128xf32> -> vector<8x128xf32>
    %102 = arith.addf %101, %33 : vector<8x128xf32>
    %c3 = arith.constant 3 : index
    %c0_53 = arith.constant 0 : index
    %c0_54 = arith.constant 0 : index
    %103 = vector.load %arg15[%c3, %c0_53, %c0_54] : memref<8x8x128xf32, #tpu.memory_space<vmem>>, vector<1x8x128xf32>
    %104 = vector.shape_cast %103 : vector<1x8x128xf32> to vector<8x128xf32>
    %105 = vector.shape_cast %102 : vector<8x128xf32> to vector<1x8x128xf32>
    tpu.vector_store %arg15[%c3, %c0_53, %c0_54], %105 {strides = array<i32>} : memref<8x8x128xf32, #tpu.memory_space<vmem>>, vector<1x8x128xf32>,
    %106 = vector.extract_strided_slice %23 {offsets = [4, 0, 0], sizes = [1, 8, 32], strides = [1, 1, 1]} : vector<8x8x32xf32> to vector<1x8x32xf32>
    %107 = vector.shape_cast %106 : vector<1x8x32xf32> to vector<8x32xf32>
    %cst_55 = arith.constant dense<0.000000e+00> : vector<8x32xf32>
    %108 = tpu.matmul %94, %24, %cst_55 {dimension_numbers = #tpu.dot_dimension_numbers<[1], [0], [0], [1], [0, 0, 1, 1], [], []>} : vector<8x32xbf16>, vector<32x32xbf16>, vector<8x32xf32> -> vector<8x32xf32>
    %109 = arith.addf %107, %108 : vector<8x32xf32>
    %110 = math.tanh %109 : vector<8x32xf32>
    %111 = arith.truncf %110 : vector<8x32xf32> to vector<8x32xbf16>
    %cst_56 = arith.constant dense<0.000000e+00> : vector<8x32xf32>
    %112 = tpu.matmul %111, %25, %cst_56 {dimension_numbers = #tpu.dot_dimension_numbers<[1], [0], [0], [1], [0, 0, 1, 1], [], []>} : vector<8x32xbf16>, vector<32x32xbf16>, vector<8x32xf32> -> vector<8x32xf32>
    %cst_57 = arith.constant dense<0.000000e+00> : vector<8x32xf32>
    %113 = tpu.matmul %100, %26, %cst_57 {dimension_numbers = #tpu.dot_dimension_numbers<[1], [0], [0], [1], [0, 0, 1, 1], [], []>} : vector<8x32xbf16>, vector<32x32xbf16>, vector<8x32xf32> -> vector<8x32xf32>
    %114 = arith.addf %112, %113 : vector<8x32xf32>
    %115 = arith.addf %114, %30 : vector<8x32xf32>
    %116 = math.tanh %115 : vector<8x32xf32>
    %117 = arith.truncf %116 : vector<8x32xf32> to vector<8x32xbf16>
    %cst_58 = arith.constant dense<0.000000e+00> : vector<8x128xf32>
    %118 = tpu.matmul %117, %27, %cst_58 {dimension_numbers = #tpu.dot_dimension_numbers<[1], [0], [0], [1], [0, 0, 1, 1], [], []>} : vector<8x32xbf16>, vector<32x128xbf16>, vector<8x128xf32> -> vector<8x128xf32>
    %119 = arith.addf %118, %33 : vector<8x128xf32>
    %c4 = arith.constant 4 : index
    %c0_59 = arith.constant 0 : index
    %c0_60 = arith.constant 0 : index
    %120 = vector.load %arg15[%c4, %c0_59, %c0_60] : memref<8x8x128xf32, #tpu.memory_space<vmem>>, vector<1x8x128xf32>
    %121 = vector.shape_cast %120 : vector<1x8x128xf32> to vector<8x128xf32>
    %122 = vector.shape_cast %119 : vector<8x128xf32> to vector<1x8x128xf32>
    tpu.vector_store %arg15[%c4, %c0_59, %c0_60], %122 {strides = array<i32>} : memref<8x8x128xf32, #tpu.memory_space<vmem>>, vector<1x8x128xf32>,
    %123 = vector.extract_strided_slice %23 {offsets = [5, 0, 0], sizes = [1, 8, 32], strides = [1, 1, 1]} : vector<8x8x32xf32> to vector<1x8x32xf32>
    %124 = vector.shape_cast %123 : vector<1x8x32xf32> to vector<8x32xf32>
    %cst_61 = arith.constant dense<0.000000e+00> : vector<8x32xf32>
    %125 = tpu.matmul %111, %24, %cst_61 {dimension_numbers = #tpu.dot_dimension_numbers<[1], [0], [0], [1], [0, 0, 1, 1], [], []>} : vector<8x32xbf16>, vector<32x32xbf16>, vector<8x32xf32> -> vector<8x32xf32>
    %126 = arith.addf %124, %125 : vector<8x32xf32>
    %127 = math.tanh %126 : vector<8x32xf32>
    %128 = arith.truncf %127 : vector<8x32xf32> to vector<8x32xbf16>
    %cst_62 = arith.constant dense<0.000000e+00> : vector<8x32xf32>
    %129 = tpu.matmul %128, %25, %cst_62 {dimension_numbers = #tpu.dot_dimension_numbers<[1], [0], [0], [1], [0, 0, 1, 1], [], []>} : vector<8x32xbf16>, vector<32x32xbf16>, vector<8x32xf32> -> vector<8x32xf32>
    %cst_63 = arith.constant dense<0.000000e+00> : vector<8x32xf32>
    %130 = tpu.matmul %117, %26, %cst_63 {dimension_numbers = #tpu.dot_dimension_numbers<[1], [0], [0], [1], [0, 0, 1, 1], [], []>} : vector<8x32xbf16>, vector<32x32xbf16>, vector<8x32xf32> -> vector<8x32xf32>
    %131 = arith.addf %129, %130 : vector<8x32xf32>
    %132 = arith.addf %131, %30 : vector<8x32xf32>
    %133 = math.tanh %132 : vector<8x32xf32>
    %134 = arith.truncf %133 : vector<8x32xf32> to vector<8x32xbf16>
    %cst_64 = arith.constant dense<0.000000e+00> : vector<8x128xf32>
    %135 = tpu.matmul %134, %27, %cst_64 {dimension_numbers = #tpu.dot_dimension_numbers<[1], [0], [0], [1], [0, 0, 1, 1], [], []>} : vector<8x32xbf16>, vector<32x128xbf16>, vector<8x128xf32> -> vector<8x128xf32>
    %136 = arith.addf %135, %33 : vector<8x128xf32>
    %c5 = arith.constant 5 : index
    %c0_65 = arith.constant 0 : index
    %c0_66 = arith.constant 0 : index
    %137 = vector.load %arg15[%c5, %c0_65, %c0_66] : memref<8x8x128xf32, #tpu.memory_space<vmem>>, vector<1x8x128xf32>
    %138 = vector.shape_cast %137 : vector<1x8x128xf32> to vector<8x128xf32>
    %139 = vector.shape_cast %136 : vector<8x128xf32> to vector<1x8x128xf32>
    tpu.vector_store %arg15[%c5, %c0_65, %c0_66], %139 {strides = array<i32>} : memref<8x8x128xf32, #tpu.memory_space<vmem>>, vector<1x8x128xf32>,
    %140 = vector.extract_strided_slice %23 {offsets = [6, 0, 0], sizes = [1, 8, 32], strides = [1, 1, 1]} : vector<8x8x32xf32> to vector<1x8x32xf32>
    %141 = vector.shape_cast %140 : vector<1x8x32xf32> to vector<8x32xf32>
    %cst_67 = arith.constant dense<0.000000e+00> : vector<8x32xf32>
    %142 = tpu.matmul %128, %24, %cst_67 {dimension_numbers = #tpu.dot_dimension_numbers<[1], [0], [0], [1], [0, 0, 1, 1], [], []>} : vector<8x32xbf16>, vector<32x32xbf16>, vector<8x32xf32> -> vector<8x32xf32>
    %143 = arith.addf %141, %142 : vector<8x32xf32>
    %144 = math.tanh %143 : vector<8x32xf32>
    %145 = arith.truncf %144 : vector<8x32xf32> to vector<8x32xbf16>
    %cst_68 = arith.constant dense<0.000000e+00> : vector<8x32xf32>
    %146 = tpu.matmul %145, %25, %cst_68 {dimension_numbers = #tpu.dot_dimension_numbers<[1], [0], [0], [1], [0, 0, 1, 1], [], []>} : vector<8x32xbf16>, vector<32x32xbf16>, vector<8x32xf32> -> vector<8x32xf32>
    %cst_69 = arith.constant dense<0.000000e+00> : vector<8x32xf32>
    %147 = tpu.matmul %134, %26, %cst_69 {dimension_numbers = #tpu.dot_dimension_numbers<[1], [0], [0], [1], [0, 0, 1, 1], [], []>} : vector<8x32xbf16>, vector<32x32xbf16>, vector<8x32xf32> -> vector<8x32xf32>
    %148 = arith.addf %146, %147 : vector<8x32xf32>
    %149 = arith.addf %148, %30 : vector<8x32xf32>
    %150 = math.tanh %149 : vector<8x32xf32>
    %151 = arith.truncf %150 : vector<8x32xf32> to vector<8x32xbf16>
    %cst_70 = arith.constant dense<0.000000e+00> : vector<8x128xf32>
    %152 = tpu.matmul %151, %27, %cst_70 {dimension_numbers = #tpu.dot_dimension_numbers<[1], [0], [0], [1], [0, 0, 1, 1], [], []>} : vector<8x32xbf16>, vector<32x128xbf16>, vector<8x128xf32> -> vector<8x128xf32>
    %153 = arith.addf %152, %33 : vector<8x128xf32>
    %c6 = arith.constant 6 : index
    %c0_71 = arith.constant 0 : index
    %c0_72 = arith.constant 0 : index
    %154 = vector.load %arg15[%c6, %c0_71, %c0_72] : memref<8x8x128xf32, #tpu.memory_space<vmem>>, vector<1x8x128xf32>
    %155 = vector.shape_cast %154 : vector<1x8x128xf32> to vector<8x128xf32>
    %156 = vector.shape_cast %153 : vector<8x128xf32> to vector<1x8x128xf32>
    tpu.vector_store %arg15[%c6, %c0_71, %c0_72], %156 {strides = array<i32>} : memref<8x8x128xf32, #tpu.memory_space<vmem>>, vector<1x8x128xf32>,
    %157 = vector.extract_strided_slice %23 {offsets = [7, 0, 0], sizes = [1, 8, 32], strides = [1, 1, 1]} : vector<8x8x32xf32> to vector<1x8x32xf32>
    %158 = vector.shape_cast %157 : vector<1x8x32xf32> to vector<8x32xf32>
    %cst_73 = arith.constant dense<0.000000e+00> : vector<8x32xf32>
    %159 = tpu.matmul %145, %24, %cst_73 {dimension_numbers = #tpu.dot_dimension_numbers<[1], [0], [0], [1], [0, 0, 1, 1], [], []>} : vector<8x32xbf16>, vector<32x32xbf16>, vector<8x32xf32> -> vector<8x32xf32>
    %160 = arith.addf %158, %159 : vector<8x32xf32>
    %161 = math.tanh %160 : vector<8x32xf32>
    %162 = arith.truncf %161 : vector<8x32xf32> to vector<8x32xbf16>
    %cst_74 = arith.constant dense<0.000000e+00> : vector<8x32xf32>
    %163 = tpu.matmul %162, %25, %cst_74 {dimension_numbers = #tpu.dot_dimension_numbers<[1], [0], [0], [1], [0, 0, 1, 1], [], []>} : vector<8x32xbf16>, vector<32x32xbf16>, vector<8x32xf32> -> vector<8x32xf32>
    %cst_75 = arith.constant dense<0.000000e+00> : vector<8x32xf32>
    %164 = tpu.matmul %151, %26, %cst_75 {dimension_numbers = #tpu.dot_dimension_numbers<[1], [0], [0], [1], [0, 0, 1, 1], [], []>} : vector<8x32xbf16>, vector<32x32xbf16>, vector<8x32xf32> -> vector<8x32xf32>
    %165 = arith.addf %163, %164 : vector<8x32xf32>
    %166 = arith.addf %165, %30 : vector<8x32xf32>
    %167 = math.tanh %166 : vector<8x32xf32>
    %168 = arith.truncf %167 : vector<8x32xf32> to vector<8x32xbf16>
    %cst_76 = arith.constant dense<0.000000e+00> : vector<8x128xf32>
    %169 = tpu.matmul %168, %27, %cst_76 {dimension_numbers = #tpu.dot_dimension_numbers<[1], [0], [0], [1], [0, 0, 1, 1], [], []>} : vector<8x32xbf16>, vector<32x128xbf16>, vector<8x128xf32> -> vector<8x128xf32>
    %170 = arith.addf %169, %33 : vector<8x128xf32>
    %c7 = arith.constant 7 : index
    %c0_77 = arith.constant 0 : index
    %c0_78 = arith.constant 0 : index
    %171 = vector.load %arg15[%c7, %c0_77, %c0_78] : memref<8x8x128xf32, #tpu.memory_space<vmem>>, vector<1x8x128xf32>
    %172 = vector.shape_cast %171 : vector<1x8x128xf32> to vector<8x128xf32>
    %173 = vector.shape_cast %170 : vector<8x128xf32> to vector<1x8x128xf32>
    tpu.vector_store %arg15[%c7, %c0_77, %c0_78], %173 {strides = array<i32>} : memref<8x8x128xf32, #tpu.memory_space<vmem>>, vector<1x8x128xf32>,
    %c0_79 = arith.constant 0 : index
    %c0_80 = arith.constant 0 : index
    %174 = vector.load %arg16[%c0_79, %c0_80] : memref<8x32xf32, #tpu.memory_space<vmem>>, vector<8x32xf32>
    tpu.vector_store %arg16[%c0_79, %c0_80], %161 {strides = array<i32>} : memref<8x32xf32, #tpu.memory_space<vmem>>, vector<8x32xf32>,
    %c0_81 = arith.constant 0 : index
    %c0_82 = arith.constant 0 : index
    %175 = vector.load %arg17[%c0_81, %c0_82] : memref<8x32xf32, #tpu.memory_space<vmem>>, vector<8x32xf32>
    tpu.vector_store %arg17[%c0_81, %c0_82], %167 {strides = array<i32>} : memref<8x32xf32, #tpu.memory_space<vmem>>, vector<8x32xf32>,
    return
  }
  func.func @transform_0(%arg0: i32, %arg1: i32) -> (i32, i32, i32) {
    %c0_i32 = arith.constant 0 : i32
    %c0_i32_0 = arith.constant 0 : i32
    return %arg1, %arg0, %c0_i32 : i32, i32, i32
  }
  func.func @transform_1(%arg0: i32, %arg1: i32) -> (i32, i32) {
    %c0_i32 = arith.constant 0 : i32
    %c0_i32_0 = arith.constant 0 : i32
    %c0_i32_1 = arith.constant 0 : i32
    return %c0_i32, %c0_i32_0 : i32, i32
  }
  func.func @transform_2(%arg0: i32, %arg1: i32) -> (i32, i32) {
    %c0_i32 = arith.constant 0 : i32
    %c0_i32_0 = arith.constant 0 : i32
    %c0_i32_1 = arith.constant 0 : i32
    return %c0_i32, %c0_i32_0 : i32, i32
  }
  func.func @transform_3(%arg0: i32, %arg1: i32) -> (i32, i32) {
    %c0_i32 = arith.constant 0 : i32
    %c0_i32_0 = arith.constant 0 : i32
    %c0_i32_1 = arith.constant 0 : i32
    return %c0_i32, %c0_i32_0 : i32, i32
  }
  func.func @transform_4(%arg0: i32, %arg1: i32) -> (i32, i32) {
    %c0_i32 = arith.constant 0 : i32
    %c0_i32_0 = arith.constant 0 : i32
    %c0_i32_1 = arith.constant 0 : i32
    return %c0_i32, %c0_i32_0 : i32, i32
  }
  func.func @transform_5(%arg0: i32, %arg1: i32) -> (i32, i32) {
    %c0_i32 = arith.constant 0 : i32
    %c0_i32_0 = arith.constant 0 : i32
    %c0_i32_1 = arith.constant 0 : i32
    return %c0_i32, %c0_i32_0 : i32, i32
  }
  func.func @transform_6(%arg0: i32, %arg1: i32) -> (i32, i32) {
    %c0_i32 = arith.constant 0 : i32
    %c0_i32_0 = arith.constant 0 : i32
    %c0_i32_1 = arith.constant 0 : i32
    return %c0_i32, %c0_i32_0 : i32, i32
  }
  func.func @transform_7(%arg0: i32, %arg1: i32) -> (i32, i32) {
    %c0_i32 = arith.constant 0 : i32
    %c0_i32_0 = arith.constant 0 : i32
    %c0_i32_1 = arith.constant 0 : i32
    return %c0_i32, %c0_i32_0 : i32, i32
  }
  func.func @transform_8(%arg0: i32, %arg1: i32) -> (i32, i32) {
    %c0_i32 = arith.constant 0 : i32
    %c0_i32_0 = arith.constant 0 : i32
    %c0_i32_1 = arith.constant 0 : i32
    return %c0_i32, %c0_i32_0 : i32, i32
  }
  func.func @transform_9(%arg0: i32, %arg1: i32) -> (i32, i32) {
    %c0_i32 = arith.constant 0 : i32
    %c0_i32_0 = arith.constant 0 : i32
    %c0_i32_1 = arith.constant 0 : i32
    return %c0_i32, %c0_i32_0 : i32, i32
  }
  func.func @transform_10(%arg0: i32, %arg1: i32) -> (i32, i32) {
    %c0_i32 = arith.constant 0 : i32
    %c0_i32_0 = arith.constant 0 : i32
    %c0_i32_1 = arith.constant 0 : i32
    return %c0_i32, %c0_i32_0 : i32, i32
  }
  func.func @transform_11(%arg0: i32, %arg1: i32) -> (i32, i32) {
    %c0_i32 = arith.constant 0 : i32
    %c0_i32_0 = arith.constant 0 : i32
    return %arg0, %c0_i32 : i32, i32
  }
  func.func @transform_12(%arg0: i32, %arg1: i32) -> (i32, i32) {
    %c0_i32 = arith.constant 0 : i32
    %c0_i32_0 = arith.constant 0 : i32
    return %arg0, %c0_i32 : i32, i32
  }
  func.func @transform_13(%arg0: i32, %arg1: i32) -> (i32, i32, i32) {
    %c0_i32 = arith.constant 0 : i32
    %c0_i32_0 = arith.constant 0 : i32
    return %arg1, %arg0, %c0_i32 : i32, i32, i32
  }
  func.func @transform_14(%arg0: i32, %arg1: i32) -> (i32, i32) {
    %c0_i32 = arith.constant 0 : i32
    %c0_i32_0 = arith.constant 0 : i32
    return %arg0, %c0_i32 : i32, i32
  }
  func.func @transform_15(%arg0: i32, %arg1: i32) -> (i32, i32) {
    %c0_i32 = arith.constant 0 : i32
    %c0_i32_0 = arith.constant 0 : i32
    return %arg0, %c0_i32 : i32, i32
  }
}

</mosaic_0001>

<bundles_post_ra>
// kernel: deepbeats_forward.1
= control target key start
LH: loop header
LB: loop body
LE: loop exit
PB: predicated region body
PF: predicated region fallthrough
CT: control target
= control target key end

     0   :  { %vm125_vm0 = vcmask 1040384   ;;  %vm112_vm1 = vcmask 146432   ;;  %vm53_vm2 = vcmask 261120   ;;  %v2362_v17 = vmov 0.0   ;;  %s2900_s1 = inlined_call_operand.vmem [shape: bf16[18,18], index: 1, kind: input, shape index: {}]   ;;  %s2901_s0 = inlined_call_operand.vmem [shape: f32[8,8,18], index: 0, kind: input, shape index: {}]   ;;  %s2902_s11 = inlined_call_operand.vmem [shape: f32[8,32], index: 11, kind: input, shape index: {}, may-alias: {11,12}]   ;;  %s2903_s3 = inlined_call_operand.vmem [shape: bf16[18,32], index: 3, kind: input, shape index: {}]   ;;  %s2904_s14 = inlined_call_operand.vmem [shape: f32[8,32], index: 14, kind: output, shape index: {1}]   ;;  %s2905_s4 = inlined_call_operand.vmem [shape: bf16[32,32], index: 4, kind: input, shape index: {}]   ;;  %s2906_s2 = inlined_call_operand.vmem [shape: f32[1,18], index: 2, kind: input, shape index: {}]   ;;  %s2907_s12 = inlined_call_operand.vmem [shape: f32[8,32], index: 12, kind: input, shape index: {}, may-alias: {11,12}]   ;;  %s2908_s15 = inlined_call_operand.vmem [shape: f32[8,32], index: 15, kind: output, shape index: {2}]   ;;  %s2909_s7 = inlined_call_operand.vmem [shape: bf16[32,32], index: 7, kind: input, shape index: {}]   ;;  %s2910_s6 = inlined_call_operand.vmem [shape: bf16[32,32], index: 6, kind: input, shape index: {}]   ;;  %s2911_s5 = inlined_call_operand.vmem [shape: f32[1,32], index: 5, kind: input, shape index: {}]   ;;  %s2912_s9 = inlined_call_operand.vmem [shape: bf16[32,128], index: 9, kind: input, shape index: {}]   ;;  %s2913_s8 = inlined_call_operand.vmem [shape: f32[1,32], index: 8, kind: input, shape index: {}]   ;;  %s2914_s10 = inlined_call_operand.vmem [shape: f32[1,128], index: 10, kind: input, shape index: {}]   ;;  %s2915_s13 = inlined_call_operand.vmem [shape: f32[8,8,128], index: 13, kind: output, shape index: {0}]  }
   0x1   :  { %v2318_v0 = vld [vmem:[%s2900_s1] sm:$0xff]   ;;  %v2319_v1 = vld [vmem:[%s2900_s1 + $0x8] ss:$0 sps:$4 sm:$0x11]   ;;  %v2465_v5 = vld [vmem:[%s2901_s0 + $0x10] sm:$0xff]  ;;  %vm2363_vm3 = vmmov 0  }
   0x2   :  { %v2453_v2 = vld [vmem:[%s2901_s0] sm:$0xff]  ;;  %v2458_v3 = vld [vmem:[%s2901_s0 + $0x8] sm:$0xff]  ;;  %2034 = vmatprep.subr.bf16.mxu0 %v2318_v0  ;;  %v2470_v6 = vld [vmem:[%s2901_s0 + $0x18] sm:$0xff]  ;;  %v127_v7 = vsel %vm125_vm0, %v2319_v1, 0 }
   0x3   :  { %v1918_v4 = vpack.c.bf16 %v2458_v3, %v2453_v2  ;;  %2035 = vmatpush3.bf16.msra.mxu0 %v2318_v0  ;;  %v2478_v8 = vld [vmem:[%s2901_s0 + $0x20] sm:$0xff]  ;;  %v2483_v9 = vld [vmem:[%s2901_s0 + $0x28] sm:$0xff]  ;;  %v1919_v10 = vpack.c.bf16 %v2470_v6, %v2465_v5  ;;  %v2494_v12 = vld [vmem:[%s2901_s0 + $0x30] sm:$0xff] }
   0x4   :  { %2314 = vmatprep.subr.msk.bf16.mxu0 %vm125_vm0, %v2319_v1  ;;  %v1920_v11 = vpack.c.bf16 %v2483_v9, %v2478_v8  ;;  %v2499_v13 = vld [vmem:[%s2901_s0 + $0x38] sm:$0xff]  ;;  %v52_v15 = vld [vmem:[%s2902_s11] sm:$0xff]  ;;  %v2322_v19 = vld [vmem:[%s2903_s3 + $0x8] ss:$0 sps:$4 sm:$0x11]  }
   0x5   :  { %2038 = vmatprep.mubr.msk.bf16.mxu0 %vm112_vm1, %v1918_v4  ;;  %v1921_v14 = vpack.c.bf16 %v2499_v13, %v2494_v12  ;;  %54 = vst.msk [vmem:[%s2904_s14] sm:$0xff] %vm53_vm2, %v52_v15  ;;  %v2514_v16 = vld [vmem:[%s2905_s4] sm:$0xff]   ;;  %v2528_v20 = vld [vmem:[%s2905_s4 + $0x8] sm:$0xff]   ;;  %v286_v21 = vsel %vm125_vm0, %v2322_v19, 0 }
   0x6   :  { %v2321_v18 = vld [vmem:[%s2903_s3] sm:$0xff]  }
   0x7   :  { %2037 = vmatpush3.bf16.msra.mxu0 %v127_v7  ;;  %2046 = vmatprep.subr.bf16.mxu1 %v2321_v18  ;;  %v1847_v24 = vld [vmem:[%s2906_s2] ss:$0 sm:$0xff] }
   0x8   :  { %2058 = vmatprep.subr.bf16.mxu0 %v2362_v17  ;;  %2047 = vmatpush3.bf16.msra.mxu1 %v2321_v18  ;;  %v2604_v18 = vld [vmem:[%s2911_s5] ss:$0 sm:$0xff] }
   0x9   :  { %2315 = vmatprep.subr.msk.bf16.mxu1 %vm125_vm0, %v2322_v19 }
   0xa   :  { %2039 = vmatmul.mubr.msk.bf16.vlgmr.msra.gmra.mrb[0].mxu0 %vm112_vm1, %v1919_v10  ;;  %v55_v10 = vld [vmem:[%s2907_s12] sm:$0xff] }
   0xb   :  { %2042 = vmatprep.mubr.msk.bf16.mxu0 %vm112_vm1, %v1920_v11  ;;  %2059 = vmatpush3.bf16.msra.mxu0 %v2514_v16  ;;  %56 = vst.msk [vmem:[%s2908_s15] sm:$0xff] %vm53_vm2, %v55_v10  ;;  %v2577_v11 = vld [vmem:[%s2910_s6] sm:$0xff]  }
   0xc   :  { %2060 = vmatprep.subr.bf16.mxu0 %v2362_v17  ;;  %v383_v22 = vld [vmem:[%s2904_s14] sm:$0xff]  ;;  %2049 = vmatpush3.bf16.msra.mxu1 %v286_v21 }
   0xd   :  { %v385_v23 = vpack.c.bf16 %v383_v22, %v383_v22  ;;  %2066 = vmatprep.subr.bf16.mxu1 %v2362_v17 }
   0xf   :  { %2061 = vmatpush3.bf16.msra.mxu0 %v2528_v20 }
  0x10   :  { %2074 = vmatprep.subr.bf16.mxu0 %v2362_v17 }
  0x12   :  { %2043 = vmatmul.mubr.msk.bf16.gmra.mrb[4].mxu0 %vm112_vm1, %v1921_v14  ;;  %v2593_v14 = vld [vmem:[%s2910_s6 + $0x8] sm:$0xff]  }
  0x13   :  { %2062 = vmatprep.mubr.msk.bf16.mxu0 %vm2363_vm3, %v2362_v17 }
  0x1a   :  { %2063 = vmatmul.mubr.msk.bf16.vlgmr.msra.gmra.mrb[8].mxu0 %vm53_vm2, %v385_v23 }
  0x1b   :  { %2078 = vmatprep.mubr.msk.bf16.mxu0 %vm2363_vm3, %v2362_v17  ;;  %2075 = vmatpush3.bf16.msra.mxu0 %v2577_v11 }
  0x1c   :  { %2076 = vmatprep.subr.bf16.mxu0 %v2362_v17 }
  0x1f   :  { %2077 = vmatpush3.bf16.msra.mxu0 %v2593_v14 }
  0x20   :  { %2090 = vmatprep.subr.bf16.mxu0 %v2362_v17 }
  0xdd   :  { %v2040_v25 = vpop.f32.mrb[0].mxu0 }
  0xde   :  { %v172_v26 = vadd.f32 %v2040_v25, %v1847_v24  ;;  %v163_v27 = vpop.f32.mrb[1].mxu0 }
  0xdf   :  { %v164_v28 = vadd.f32 %v1847_v24, %v163_v27  ;;  %v2041_v29 = vpop.f32.mrb[2].mxu0 }
  0xe0   :  { %vm196_vm4 = vcmp.ge.f32.partialorder %v172_v26, 0.0  ;;  %v204_v30 = vmul.f32 0.01, %v172_v26  ;;  %v175_v31 = vadd.f32 %v2041_v29, %v1847_v24  ;;  %v166_v32 = vpop.f32.mrb[3].mxu0 }
  0xe1   :  { %vm194_vm5 = vcmp.ge.f32.partialorder %v164_v28, 0.0  ;;  %v202_v33 = vmul.f32 0.01, %v164_v28  ;;  %v167_v34 = vadd.f32 %v1847_v24, %v166_v32 }
  0xe2   :  { %v212_v35 = vsel %vm196_vm4, %v172_v26, %v204_v30  ;;  %vm197_vm6 = vcmp.ge.f32.partialorder %v175_v31, 0.0  ;;  %v205_v36 = vmul.f32 0.01, %v175_v31 }
  0xe3   :  { %vm195_vm7 = vcmp.ge.f32.partialorder %v167_v34, 0.0  ;;  %v203_v37 = vmul.f32 0.01, %v167_v34  ;;  %v210_v38 = vsel %vm194_vm5, %v164_v28, %v202_v33  ;;  %v220_v40 = vadd.f32 %v212_v35, %v2465_v5 }
  0xe4   :  { %v213_v39 = vsel %vm197_vm6, %v175_v31, %v205_v36  ;;  %v218_v43 = vadd.f32 %v210_v38, %v2453_v2  ;;  %v2636_v36 = vld [vmem:[%s2912_s9] sm:$0xff]  }
  0xe5   :  { %v221_v41 = vadd.f32 %v213_v39, %v2470_v6  ;;  %v211_v42 = vsel %vm195_vm7, %v167_v34, %v203_v37  ;;  %v2044_v47 = vpop.f32.mrb[4].mxu0  ;;  %v2643_v37 = vld [vmem:[%s2912_s9 + $0x8] sm:$0xff]   ;;  %v2650_v38 = vld [vmem:[%s2913_s8] ss:$0 sm:$0xff] }
  0xe6   :  { %v219_v44 = vadd.f32 %v211_v42, %v2458_v3  ;;  %v188_v48 = vadd.f32 %v2044_v47, %v1847_v24  ;;  %v179_v49 = vpop.f32.mrb[5].mxu0 }
  0xe7   :  { %v1923_v45 = vpack.c.bf16 %v221_v41, %v220_v40  ;;  %v180_v50 = vadd.f32 %v1847_v24, %v179_v49  ;;  %v2045_v51 = vpop.f32.mrb[6].mxu0 }
  0xe8   :  { %v1922_v46 = vpack.c.bf16 %v219_v44, %v218_v43  ;;  %vm200_vm8 = vcmp.ge.f32.partialorder %v188_v48, 0.0  ;;  %v208_v52 = vmul.f32 0.01, %v188_v48  ;;  %v191_v53 = vadd.f32 %v2045_v51, %v1847_v24  ;;  %v182_v54 = vpop.f32.mrb[7].mxu0 }
  0xe9   :  { %vm198_vm9 = vcmp.ge.f32.partialorder %v180_v50, 0.0  ;;  %v206_v55 = vmul.f32 0.01, %v180_v50  ;;  %v183_v56 = vadd.f32 %v1847_v24, %v182_v54 }
  0xea   :  { %2050 = vmatprep.mubr.msk.bf16.mxu1 %vm112_vm1, %v1922_v46  ;;  %v216_v57 = vsel %vm200_vm8, %v188_v48, %v208_v52  ;;  %vm201_vm10 = vcmp.ge.f32.partialorder %v191_v53, 0.0  ;;  %v209_v58 = vmul.f32 0.01, %v191_v53 }
  0xeb   :  { %2051 = vmatmul.mubr.msk.bf16.vlgmr.msra.gmra.mrb[0].mxu1 %vm112_vm1, %v1923_v45  ;;  %v214_v59 = vsel %vm198_vm9, %v180_v50, %v206_v55  ;;  %vm199_vm11 = vcmp.ge.f32.partialorder %v183_v56, 0.0  ;;  %v207_v60 = vmul.f32 0.01, %v183_v56  ;;  %v224_v63 = vadd.f32 %v216_v57, %v2494_v12  ;;  %v2582_v12 = vld [vmem:[%s2909_s7 + $0x8] sm:$0xff]   ;;  %v2685_v55 = vld [vmem:[%s2914_s10] ss:$0 sm:$0xff] }
  0xec   :  { %v222_v61 = vadd.f32 %v214_v59, %v2478_v8  ;;  %v217_v62 = vsel %vm201_vm10, %v191_v53, %v209_v58 }
  0xed   :  { %v225_v0 = vadd.f32 %v217_v62, %v2499_v13  ;;  %v215_v1 = vsel %vm199_vm11, %v183_v56, %v207_v60  ;;  %v437_v5 = vpop.f32.mrb[8].mxu0  ;;  %v384_v13 = vld [vmem:[%s2908_s15] sm:$0xff] }
  0xee   :  { %v223_v2 = vadd.f32 %v215_v1, %v2483_v9  ;;  %v2064_v6 = vpop.f32.mrb[9].mxu0  ;;  %v2570_v9 = vld [vmem:[%s2909_s7] sm:$0xff]   ;;  %v386_v15 = vpack.c.bf16 %v384_v13, %v384_v13 }
  0xef   :  { %v1925_v4 = vpack.c.bf16 %v225_v0, %v224_v63  ;;  %v440_v7 = vpop.f32.mrb[10].mxu0  ;;  %2067 = vmatpush3.bf16.msra.mxu1 %v2570_v9 }
  0xf0   :  { %v1924_v3 = vpack.c.bf16 %v223_v2, %v222_v61  ;;  %v2065_v8 = vpop.f32.mrb[11].mxu0  ;;  %2068 = vmatprep.subr.bf16.mxu1 %v2362_v17 }
  0xf2   :  { %2054 = vmatprep.mubr.msk.bf16.mxu1 %vm112_vm1, %v1924_v3 }
  0xf3   :  { %2055 = vmatmul.mubr.msk.bf16.gmra.mrb[4].mxu1 %vm112_vm1, %v1925_v4 }
  0xf4   :  { %2070 = vmatprep.mubr.msk.bf16.mxu1 %vm2363_vm3, %v2362_v17  ;;  %2069 = vmatpush3.bf16.msra.mxu1 %v2582_v12 }
  0xf5   :  { %2082 = vmatprep.subr.bf16.mxu1 %v2362_v17 }
  0xfb   :  { %2071 = vmatmul.mubr.msk.bf16.vlgmr.msra.gmra.mrb[8].mxu1 %vm53_vm2, %v386_v15 }
  0xfc   :  { %2086 = vmatprep.mubr.msk.bf16.mxu1 %vm2363_vm3, %v2362_v17  ;;  %2083 = vmatpush3.bf16.msra.mxu1 %v2636_v36 }
  0xfd   :  { %2084 = vmatprep.subr.bf16.mxu1 %v2362_v17 }
 0x100   :  { %2085 = vmatpush3.bf16.msra.mxu1 %v2643_v37 }
 0x101   :  { %2098 = vmatprep.subr.bf16.mxu1 %v2362_v17 }
 0x1be   :  { %v2606_v19 = vpop.f32.mrb[0].mxu1 }
 0x1bf   :  { %v322_v21 = vpop.f32.mrb[1].mxu1  ;;  %v331_v7 = vadd.f32 %v2606_v19, %v2604_v18 }
 0x1c0   :  { %v323_v22 = vadd.f32 %v2604_v18, %v322_v21  ;;  %v2609_v23 = vpop.f32.mrb[2].mxu1 }
 0x1c1   :  { %v325_v24 = vpop.f32.mrb[3].mxu1 }
 0x1c2   :  { %v443_v25 = vadd.f32 %v437_v5, %v323_v22  ;;  %v326_v45 = vadd.f32 %v2604_v18, %v325_v24 }
 0x1c4   :  { %2330 = vtanh.f32 %v443_v25 }
 0x1c6   :  { %v2625_v28 = vpop.f32.mrb[4].mxu1 }
 0x1c7   :  { %v2627_v29 = vpop.f32.mrb[5].mxu1 }
 0x1c8   :  { %v2629_v30 = vpop.f32.mrb[6].mxu1 }
 0x1c9   :  { %v2631_v31 = vpop.f32.mrb[7].mxu1 }
 0x1ce   :  { %v2331_v26 = vpop.eup %2330  ;;  %v495_v32 = vpop.f32.mrb[8].mxu1 }
 0x1cf   :  { %v445_v27 = vpack.c.bf16 %v2331_v26, %v2331_v26  ;;  %v2072_v33 = vpop.f32.mrb[9].mxu1 }
 0x1d0   :  { %v498_v34 = vpop.f32.mrb[10].mxu1 }
 0x1d1   :  { %2079 = vmatmul.mubr.msk.bf16.vlgmr.msra.gmra.mrb[12].mxu0 %vm53_vm2, %v445_v27  ;;  %v2073_v35 = vpop.f32.mrb[11].mxu1 }
 0x1d2   :  { %2091 = vmatpush3.bf16.msra.mxu0 %v2514_v16  ;;  %2094 = vmatprep.mubr.msk.bf16.mxu0 %vm2363_vm3, %v2362_v17 }
 0x1d3   :  { %2092 = vmatprep.subr.bf16.mxu0 %v2362_v17 }
 0x1d6   :  { %2093 = vmatpush3.bf16.msra.mxu0 %v2528_v20 }
 0x1d7   :  { %2106 = vmatprep.subr.bf16.mxu0 %v2362_v17 }
 0x1d9   :  { %2095 = vmatmul.mubr.msk.bf16.vlgmr.msra.gmra.mrb[16].mxu0 %vm53_vm2, %v445_v27 }
 0x1da   :  { %2107 = vmatpush3.bf16.msra.mxu0 %v2577_v11  ;;  %2110 = vmatprep.mubr.msk.bf16.mxu0 %vm2363_vm3, %v2362_v17 }
 0x1db   :  { %2108 = vmatprep.subr.bf16.mxu0 %v2362_v17 }
 0x1de   :  { %2109 = vmatpush3.bf16.msra.mxu0 %v2593_v14 }
 0x1df   :  { %2122 = vmatprep.subr.bf16.mxu0 %v2362_v17 }
 0x2a4   :  { %v550_v39 = vpop.f32.mrb[12].mxu0 }
 0x2a5   :  { %v551_v40 = vadd.f32 %v550_v39, %v495_v32  ;;  %v2080_v41 = vpop.f32.mrb[13].mxu0 }
 0x2a6   :  { %v553_v42 = vpop.f32.mrb[14].mxu0 }
 0x2a7   :  { %v556_v43 = vadd.f32 %v2650_v38, %v551_v40  ;;  %v2081_v44 = vpop.f32.mrb[15].mxu0 }
 0x2a9   :  { %2332 = vtanh.f32 %v556_v43 }
 0x2ac   :  { %v649_v46 = vpop.f32.mrb[16].mxu0 }
 0x2ad   :  { %v655_v47 = vadd.f32 %v649_v46, %v326_v45  ;;  %v2096_v48 = vpop.f32.mrb[17].mxu0  ;;  %v334_v46 = vadd.f32 %v2609_v23, %v2604_v18 }
 0x2ae   :  { %v652_v49 = vpop.f32.mrb[18].mxu0 }
 0x2af   :  { %2334 = vtanh.f32 %v655_v47  ;;  %v2097_v50 = vpop.f32.mrb[19].mxu0 }
 0x2b3   :  { %v2333_v51 = vpop.eup %2332 }
 0x2b4   :  { %v558_v52 = vpack.c.bf16 %v2333_v51, %v2333_v51 }
 0x2b6   :  { %2087 = vmatmul.mubr.msk.bf16.vlgmr.msra.gmra.mrb[12].mxu1 %vm53_vm2, %v558_v52 }
 0x2b7   :  { %2099 = vmatpush3.bf16.msra.mxu1 %v2570_v9  ;;  %2102 = vmatprep.mubr.msk.bf16.mxu1 %vm2363_vm3, %v2362_v17 }
 0x2b8   :  { %2100 = vmatprep.subr.bf16.mxu1 %v2362_v17 }
 0x2b9   :  { %v2335_v53 = vpop.eup %2334 }
 0x2ba   :  { %v657_v54 = vpack.c.bf16 %v2335_v53, %v2335_v53 }
 0x2bb   :  { %2101 = vmatpush3.bf16.msra.mxu1 %v2582_v12 }
 0x2bc   :  { %2111 = vmatmul.mubr.msk.bf16.vlgmr.msra.gmra.mrb[20].mxu0 %vm53_vm2, %v657_v54  ;;  %2114 = vmatprep.subr.bf16.mxu1 %v2362_v17 }
 0x2bd   :  { %2123 = vmatpush3.bf16.msra.mxu0 %v2514_v16  ;;  %2126 = vmatprep.mubr.msk.bf16.mxu0 %vm2363_vm3, %v2362_v17 }
 0x2be   :  { %2103 = vmatmul.mubr.msk.bf16.vlgmr.msra.gmra.mrb[16].mxu1 %vm53_vm2, %v558_v52  ;;  %2124 = vmatprep.subr.bf16.mxu0 %v2362_v17 }
 0x2bf   :  { %2115 = vmatpush3.bf16.msra.mxu1 %v2636_v36  ;;  %2118 = vmatprep.mubr.msk.bf16.mxu1 %vm2363_vm3, %v2362_v17 }
 0x2c0   :  { %2116 = vmatprep.subr.bf16.mxu1 %v2362_v17 }
 0x2c1   :  { %2125 = vmatpush3.bf16.msra.mxu0 %v2528_v20 }
 0x2c2   :  { %2138 = vmatprep.subr.bf16.mxu0 %v2362_v17 }
 0x2c3   :  { %2117 = vmatpush3.bf16.msra.mxu1 %v2643_v37 }
 0x2c4   :  { %2127 = vmatmul.mubr.msk.bf16.vlgmr.msra.gmra.mrb[24].mxu0 %vm53_vm2, %v657_v54  ;;  %2130 = vmatprep.subr.bf16.mxu1 %v2362_v17 }
 0x2c5   :  { %2139 = vmatpush3.bf16.msra.mxu0 %v2577_v11  ;;  %2142 = vmatprep.mubr.msk.bf16.mxu0 %vm2363_vm3, %v2362_v17 }
 0x2c6   :  { %2140 = vmatprep.subr.bf16.mxu0 %v2362_v17 }
 0x2c9   :  { %2141 = vmatpush3.bf16.msra.mxu0 %v2593_v14 }
 0x2ca   :  { %2154 = vmatprep.subr.bf16.mxu0 %v2362_v17 }
 0x389   :  { %v608_v56 = vpop.f32.mrb[12].mxu1 }
 0x38a   :  { %v609_v57 = vadd.f32 %v2685_v55, %v608_v56  ;;  %v2088_v58 = vpop.f32.mrb[13].mxu1 }
 0x38b   :  { %v611_v59 = vpop.f32.mrb[14].mxu1 }
 0x38c   :  { %614 = vst [vmem:[%s2915_s13] sm:$0xff] %v609_v57  ;;  %v2089_v60 = vpop.f32.mrb[15].mxu1 }
 0x38f   :  { %v735_v61 = vpop.f32.mrb[20].mxu0 }
 0x390   :  { %v2112_v62 = vpop.f32.mrb[21].mxu0 }
 0x391   :  { %v692_v63 = vpop.f32.mrb[16].mxu1  ;;  %v738_v0 = vpop.f32.mrb[22].mxu0 }
 0x392   :  { %v736_v1 = vadd.f32 %v735_v61, %v692_v63  ;;  %v2104_v2 = vpop.f32.mrb[17].mxu1  ;;  %v2113_v3 = vpop.f32.mrb[23].mxu0 }
 0x393   :  { %v695_v4 = vpop.f32.mrb[18].mxu1 }
 0x394   :  { %v741_v5 = vadd.f32 %v2650_v38, %v736_v1  ;;  %v2105_v6 = vpop.f32.mrb[19].mxu1  ;;  %v339_v4 = vadd.f32 %v2604_v18, %v2627_v29 }
 0x396   :  { %2336 = vtanh.f32 %v741_v5 }
 0x397   :  { %v823_v8 = vpop.f32.mrb[24].mxu0 }
 0x398   :  { %v829_v10 = vadd.f32 %v823_v8, %v331_v7  ;;  %v2128_v13 = vpop.f32.mrb[25].mxu0 }
 0x399   :  { %v826_v15 = vpop.f32.mrb[26].mxu0 }
 0x39a   :  { %2338 = vtanh.f32 %v829_v10  ;;  %v2129_v21 = vpop.f32.mrb[27].mxu0 }
 0x3a0   :  { %v2337_v22 = vpop.eup %2336 }
 0x3a1   :  { %v743_v24 = vpack.c.bf16 %v2337_v22, %v2337_v22 }
 0x3a3   :  { %2119 = vmatmul.mubr.msk.bf16.vlgmr.msra.gmra.mrb[20].mxu1 %vm53_vm2, %v743_v24 }
 0x3a4   :  { %v2339_v25 = vpop.eup %2338  ;;  %2131 = vmatpush3.bf16.msra.mxu1 %v2570_v9  ;;  %2134 = vmatprep.mubr.msk.bf16.mxu1 %vm2363_vm3, %v2362_v17 }
 0x3a5   :  { %v831_v26 = vpack.c.bf16 %v2339_v25, %v2339_v25  ;;  %2132 = vmatprep.subr.bf16.mxu1 %v2362_v17 }
 0x3a7   :  { %2143 = vmatmul.mubr.msk.bf16.vlgmr.msra.gmra.mrb[28].mxu0 %vm53_vm2, %v831_v26 }
 0x3a8   :  { %2133 = vmatpush3.bf16.msra.mxu1 %v2582_v12  ;;  %2155 = vmatpush3.bf16.msra.mxu0 %v2514_v16 }
 0x3a9   :  { %2156 = vmatprep.subr.bf16.mxu0 %v2362_v17  ;;  %2158 = vmatprep.mubr.msk.bf16.mxu0 %vm2363_vm3, %v2362_v17 }
 0x3aa   :  { %2146 = vmatprep.subr.bf16.mxu1 %v2362_v17 }
 0x3ab   :  { %2135 = vmatmul.mubr.msk.bf16.vlgmr.msra.gmra.mrb[24].mxu1 %vm53_vm2, %v743_v24 }
 0x3ac   :  { %2157 = vmatpush3.bf16.msra.mxu0 %v2528_v20  ;;  %2147 = vmatpush3.bf16.msra.mxu1 %v2636_v36 }
 0x3ad   :  { %2170 = vmatprep.subr.bf16.mxu0 %v2362_v17  ;;  %2148 = vmatprep.subr.bf16.mxu1 %v2362_v17 }
 0x3ae   :  { %2150 = vmatprep.mubr.msk.bf16.mxu1 %vm2363_vm3, %v2362_v17 }
 0x3af   :  { %2159 = vmatmul.mubr.msk.bf16.vlgmr.msra.gmra.mrb[32].mxu0 %vm53_vm2, %v831_v26 }
 0x3b0   :  { %2171 = vmatpush3.bf16.msra.mxu0 %v2577_v11  ;;  %2149 = vmatpush3.bf16.msra.mxu1 %v2643_v37 }
 0x3b1   :  { %2172 = vmatprep.subr.bf16.mxu0 %v2362_v17  ;;  %2162 = vmatprep.subr.bf16.mxu1 %v2362_v17 }
 0x3b2   :  { %2174 = vmatprep.mubr.msk.bf16.mxu0 %vm2363_vm3, %v2362_v17 }
 0x3b4   :  { %2173 = vmatpush3.bf16.msra.mxu0 %v2593_v14 }
 0x3b5   :  { %2186 = vmatprep.subr.bf16.mxu0 %v2362_v17 }
 0x476   :  { %v781_v19 = vpop.f32.mrb[20].mxu1 }
 0x477   :  { %v782_v27 = vadd.f32 %v2685_v55, %v781_v19  ;;  %v2120_v32 = vpop.f32.mrb[21].mxu1 }
 0x478   :  { %v784_v33 = vpop.f32.mrb[22].mxu1 }
 0x479   :  { %1887 = vst [vmem:[%s2915_s13 + $0x8] sm:$0xff] %v782_v27  ;;  %v2121_v34 = vpop.f32.mrb[23].mxu1 }
 0x47a   :  { %v909_v35 = vpop.f32.mrb[28].mxu0 }
 0x47b   :  { %v2144_v39 = vpop.f32.mrb[29].mxu0 }
 0x47c   :  { %v912_v40 = vpop.f32.mrb[30].mxu0 }
 0x47d   :  { %v2145_v41 = vpop.f32.mrb[31].mxu0 }
 0x47e   :  { %v866_v42 = vpop.f32.mrb[24].mxu1 }
 0x47f   :  { %v910_v43 = vadd.f32 %v909_v35, %v866_v42  ;;  %v2136_v44 = vpop.f32.mrb[25].mxu1 }
 0x480   :  { %v869_v45 = vpop.f32.mrb[26].mxu1 }
 0x481   :  { %v915_v47 = vadd.f32 %v2650_v38, %v910_v43  ;;  %v2137_v48 = vpop.f32.mrb[27].mxu1  ;;  %v342_v43 = vadd.f32 %v2604_v18, %v2631_v31 }
 0x482   :  { %v997_v49 = vpop.f32.mrb[32].mxu0 }
 0x483   :  { %2340 = vtanh.f32 %v915_v47  ;;  %v1003_v50 = vadd.f32 %v997_v49, %v334_v46  ;;  %v2160_v51 = vpop.f32.mrb[33].mxu0 }
 0x484   :  { %v1000_v52 = vpop.f32.mrb[34].mxu0 }
 0x485   :  { %2342 = vtanh.f32 %v1003_v50  ;;  %v2161_v53 = vpop.f32.mrb[35].mxu0 }
 0x48d   :  { %v2341_v54 = vpop.eup %2340 }
 0x48e   :  { %v917_v56 = vpack.c.bf16 %v2341_v54, %v2341_v54 }
 0x48f   :  { %v2343_v57 = vpop.eup %2342 }
 0x490   :  { %v1005_v58 = vpack.c.bf16 %v2343_v57, %v2343_v57  ;;  %2151 = vmatmul.mubr.msk.bf16.vlgmr.msra.gmra.mrb[28].mxu1 %vm53_vm2, %v917_v56 }
 0x491   :  { %2163 = vmatpush3.bf16.msra.mxu1 %v2570_v9  ;;  %2166 = vmatprep.mubr.msk.bf16.mxu1 %vm2363_vm3, %v2362_v17 }
 0x492   :  { %2175 = vmatmul.mubr.msk.bf16.vlgmr.msra.gmra.mrb[36].mxu0 %vm53_vm2, %v1005_v58  ;;  %2164 = vmatprep.subr.bf16.mxu1 %v2362_v17 }
 0x493   :  { %2187 = vmatpush3.bf16.msra.mxu0 %v2514_v16  ;;  %2190 = vmatprep.mubr.msk.bf16.mxu0 %vm2363_vm3, %v2362_v17 }
 0x494   :  { %2188 = vmatprep.subr.bf16.mxu0 %v2362_v17 }
 0x495   :  { %2165 = vmatpush3.bf16.msra.mxu1 %v2582_v12 }
 0x496   :  { %2178 = vmatprep.subr.bf16.mxu1 %v2362_v17 }
 0x497   :  { %2189 = vmatpush3.bf16.msra.mxu0 %v2528_v20 }
 0x498   :  { %2167 = vmatmul.mubr.msk.bf16.vlgmr.msra.gmra.mrb[32].mxu1 %vm53_vm2, %v917_v56  ;;  %2202 = vmatprep.subr.bf16.mxu0 %v2362_v17 }
 0x499   :  { %2179 = vmatpush3.bf16.msra.mxu1 %v2636_v36  ;;  %2182 = vmatprep.mubr.msk.bf16.mxu1 %vm2363_vm3, %v2362_v17 }
 0x49a   :  { %2191 = vmatmul.mubr.msk.bf16.vlgmr.msra.gmra.mrb[40].mxu0 %vm53_vm2, %v1005_v58  ;;  %2180 = vmatprep.subr.bf16.mxu1 %v2362_v17 }
 0x49b   :  { %2203 = vmatpush3.bf16.msra.mxu0 %v2577_v11  ;;  %2206 = vmatprep.mubr.msk.bf16.mxu0 %vm2363_vm3, %v2362_v17 }
 0x49c   :  { %2204 = vmatprep.subr.bf16.mxu0 %v2362_v17 }
 0x49d   :  { %2181 = vmatpush3.bf16.msra.mxu1 %v2643_v37 }
 0x49e   :  { %2194 = vmatprep.subr.bf16.mxu1 %v2362_v17 }
 0x49f   :  { %2205 = vmatpush3.bf16.msra.mxu0 %v2593_v14 }
 0x4a0   :  { %2218 = vmatprep.subr.bf16.mxu0 %v2362_v17 }
 0x563   :  { %v955_v23 = vpop.f32.mrb[28].mxu1 }
 0x564   :  { %v956_v59 = vadd.f32 %v2685_v55, %v955_v23  ;;  %v2152_v60 = vpop.f32.mrb[29].mxu1 }
 0x565   :  { %v958_v61 = vpop.f32.mrb[30].mxu1  ;;  %v1083_v62 = vpop.f32.mrb[36].mxu0 }
 0x566   :  { %1892 = vst [vmem:[%s2915_s13 + $0x10] sm:$0xff] %v956_v59  ;;  %v2153_v63 = vpop.f32.mrb[31].mxu1  ;;  %v2176_v0 = vpop.f32.mrb[37].mxu0 }
 0x567   :  { %v1086_v1 = vpop.f32.mrb[38].mxu0 }
 0x568   :  { %v2177_v2 = vpop.f32.mrb[39].mxu0 }
 0x56b   :  { %v1040_v3 = vpop.f32.mrb[32].mxu1 }
 0x56c   :  { %v1084_v5 = vadd.f32 %v1083_v62, %v1040_v3  ;;  %v2168_v6 = vpop.f32.mrb[33].mxu1  ;;  %v347_v3 = vadd.f32 %v2625_v28, %v2604_v18 }
 0x56d   :  { %v1043_v7 = vpop.f32.mrb[34].mxu1  ;;  %v1171_v8 = vpop.f32.mrb[40].mxu0 }
 0x56e   :  { %v1089_v10 = vadd.f32 %v2650_v38, %v1084_v5  ;;  %v1177_v13 = vadd.f32 %v1171_v8, %v339_v4  ;;  %v2169_v15 = vpop.f32.mrb[35].mxu1  ;;  %v2192_v21 = vpop.f32.mrb[41].mxu0 }
 0x56f   :  { %v1174_v22 = vpop.f32.mrb[42].mxu0 }
 0x570   :  { %2344 = vtanh.f32 %v1089_v10  ;;  %v2193_v24 = vpop.f32.mrb[43].mxu0 }
 0x571   :  { %2346 = vtanh.f32 %v1177_v13 }
 0x57a   :  { %v2345_v25 = vpop.eup %2344 }
 0x57b   :  { %v2347_v26 = vpop.eup %2346  ;;  %v1091_v19 = vpack.c.bf16 %v2345_v25, %v2345_v25 }
 0x57c   :  { %v1179_v27 = vpack.c.bf16 %v2347_v26, %v2347_v26 }
 0x57d   :  { %2183 = vmatmul.mubr.msk.bf16.vlgmr.msra.gmra.mrb[36].mxu1 %vm53_vm2, %v1091_v19 }
 0x57e   :  { %2195 = vmatpush3.bf16.msra.mxu1 %v2570_v9  ;;  %2207 = vmatmul.mubr.msk.bf16.vlgmr.msra.gmra.mrb[44].mxu0 %vm53_vm2, %v1179_v27 }
 0x57f   :  { %2219 = vmatpush3.bf16.msra.mxu0 %v2514_v16  ;;  %2196 = vmatprep.subr.bf16.mxu1 %v2362_v17 }
 0x580   :  { %2220 = vmatprep.subr.bf16.mxu0 %v2362_v17  ;;  %2198 = vmatprep.mubr.msk.bf16.mxu1 %vm2363_vm3, %v2362_v17 }
 0x581   :  { %2222 = vmatprep.mubr.msk.bf16.mxu0 %vm2363_vm3, %v2362_v17 }
 0x582   :  { %2197 = vmatpush3.bf16.msra.mxu1 %v2582_v12 }
 0x583   :  { %2221 = vmatpush3.bf16.msra.mxu0 %v2528_v20  ;;  %2210 = vmatprep.subr.bf16.mxu1 %v2362_v17 }
 0x584   :  { %2234 = vmatprep.subr.bf16.mxu0 %v2362_v17 }
 0x585   :  { %2199 = vmatmul.mubr.msk.bf16.vlgmr.msra.gmra.mrb[40].mxu1 %vm53_vm2, %v1091_v19 }
 0x586   :  { %2223 = vmatmul.mubr.msk.bf16.vlgmr.msra.gmra.mrb[48].mxu0 %vm53_vm2, %v1179_v27  ;;  %2211 = vmatpush3.bf16.msra.mxu1 %v2636_v36 }
 0x587   :  { %2235 = vmatpush3.bf16.msra.mxu0 %v2577_v11  ;;  %2212 = vmatprep.subr.bf16.mxu1 %v2362_v17 }
 0x588   :  { %2236 = vmatprep.subr.bf16.mxu0 %v2362_v17  ;;  %2238 = vmatprep.mubr.msk.bf16.mxu0 %vm2363_vm3, %v2362_v17 }
 0x589   :  { %2214 = vmatprep.mubr.msk.bf16.mxu1 %vm2363_vm3, %v2362_v17 }
 0x58a   :  { %2213 = vmatpush3.bf16.msra.mxu1 %v2643_v37 }
 0x58b   :  { %2237 = vmatpush3.bf16.msra.mxu0 %v2593_v14  ;;  %2226 = vmatprep.subr.bf16.mxu1 %v2362_v17 }
 0x58c   :  { %2250 = vmatprep.subr.bf16.mxu0 %v2362_v17 }
 0x650   :  { %v1129_v29 = vpop.f32.mrb[36].mxu1 }
 0x651   :  { %v1130_v32 = vadd.f32 %v2685_v55, %v1129_v29  ;;  %v1257_v33 = vpop.f32.mrb[44].mxu0  ;;  %v2184_v34 = vpop.f32.mrb[37].mxu1 }
 0x652   :  { %v2208_v35 = vpop.f32.mrb[45].mxu0  ;;  %v1132_v39 = vpop.f32.mrb[38].mxu1 }
 0x653   :  { %1897 = vst [vmem:[%s2915_s13 + $0x18] sm:$0xff] %v1130_v32  ;;  %v1260_v40 = vpop.f32.mrb[46].mxu0  ;;  %v2185_v41 = vpop.f32.mrb[39].mxu1  ;;  %v350_v35 = vadd.f32 %v2629_v30, %v2604_v18 }
 0x654   :  { %v2209_v42 = vpop.f32.mrb[47].mxu0 }
 0x658   :  { %v1214_v44 = vpop.f32.mrb[40].mxu1 }
 0x659   :  { %v1258_v45 = vadd.f32 %v1257_v33, %v1214_v44  ;;  %v1345_v46 = vpop.f32.mrb[48].mxu0  ;;  %v2200_v47 = vpop.f32.mrb[41].mxu1 }
 0x65a   :  { %v1351_v48 = vadd.f32 %v1345_v46, %v342_v43  ;;  %v2224_v49 = vpop.f32.mrb[49].mxu0  ;;  %v1217_v50 = vpop.f32.mrb[42].mxu1 }
 0x65b   :  { %v1263_v51 = vadd.f32 %v2650_v38, %v1258_v45  ;;  %v1348_v52 = vpop.f32.mrb[50].mxu0  ;;  %v2201_v53 = vpop.f32.mrb[43].mxu1 }
 0x65c   :  { %2348 = vtanh.f32 %v1351_v48  ;;  %v2225_v54 = vpop.f32.mrb[51].mxu0 }
 0x65d   :  { %2350 = vtanh.f32 %v1263_v51 }
 0x666   :  { %v2349_v56 = vpop.eup %2348 }
 0x667   :  { %v2351_v57 = vpop.eup %2350  ;;  %v1353_v58 = vpack.c.bf16 %v2349_v56, %v2349_v56 }
 0x668   :  { %v1265_v23 = vpack.c.bf16 %v2351_v57, %v2351_v57 }
 0x669   :  { %2239 = vmatmul.mubr.msk.bf16.vlgmr.msra.gmra.mrb[52].mxu0 %vm53_vm2, %v1353_v58 }
 0x66a   :  { %2251 = vmatpush3.bf16.msra.mxu0 %v2514_v16  ;;  %2215 = vmatmul.mubr.msk.bf16.vlgmr.msra.gmra.mrb[44].mxu1 %vm53_vm2, %v1265_v23 }
 0x66b   :  { %2227 = vmatpush3.bf16.msra.mxu1 %v2570_v9  ;;  %2252 = vmatprep.subr.bf16.mxu0 %v2362_v17 }
 0x66c   :  { %2228 = vmatprep.subr.bf16.mxu1 %v2362_v17  ;;  %2254 = vmatprep.mubr.msk.bf16.mxu0 %vm2363_vm3, %v2362_v17 }
 0x66d   :  { %2230 = vmatprep.mubr.msk.bf16.mxu1 %vm2363_vm3, %v2362_v17 }
 0x66e   :  { %2253 = vmatpush3.bf16.msra.mxu0 %v2528_v20 }
 0x66f   :  { %2229 = vmatpush3.bf16.msra.mxu1 %v2582_v12  ;;  %2266 = vmatprep.subr.bf16.mxu0 %v2362_v17 }
 0x670   :  { %2242 = vmatprep.subr.bf16.mxu1 %v2362_v17 }
 0x671   :  { %2255 = vmatmul.mubr.msk.bf16.vlgmr.msra.gmra.mrb[56].mxu0 %vm53_vm2, %v1353_v58 }
 0x672   :  { %2231 = vmatmul.mubr.msk.bf16.vlgmr.msra.gmra.mrb[48].mxu1 %vm53_vm2, %v1265_v23  ;;  %2267 = vmatpush3.bf16.msra.mxu0 %v2577_v11 }
 0x673   :  { %2243 = vmatpush3.bf16.msra.mxu1 %v2636_v36  ;;  %2268 = vmatprep.subr.bf16.mxu0 %v2362_v17 }
 0x674   :  { %2244 = vmatprep.subr.bf16.mxu1 %v2362_v17  ;;  %2270 = vmatprep.mubr.msk.bf16.mxu0 %vm2363_vm3, %v2362_v17 }
 0x675   :  { %2246 = vmatprep.mubr.msk.bf16.mxu1 %vm2363_vm3, %v2362_v17 }
 0x676   :  { %2269 = vmatpush3.bf16.msra.mxu0 %v2593_v14 }
 0x677   :  { %2245 = vmatpush3.bf16.msra.mxu1 %v2643_v37  ;;  %2282 = vmatprep.subr.bf16.mxu0 %v2362_v17 }
 0x678   :  { %2258 = vmatprep.subr.bf16.mxu1 %v2362_v17 }
 0x73c   :  { %v1431_v31 = vpop.f32.mrb[52].mxu0 }
 0x73d   :  { %v2240_v59 = vpop.f32.mrb[53].mxu0  ;;  %v1303_v60 = vpop.f32.mrb[44].mxu1 }
 0x73e   :  { %v1304_v61 = vadd.f32 %v2685_v55, %v1303_v60  ;;  %v1434_v62 = vpop.f32.mrb[54].mxu0  ;;  %v2216_v63 = vpop.f32.mrb[45].mxu1 }
 0x73f   :  { %v2241_v0 = vpop.f32.mrb[55].mxu0  ;;  %v1306_v1 = vpop.f32.mrb[46].mxu1 }
 0x740   :  { %1902 = vst [vmem:[%s2915_s13 + $0x20] sm:$0xff] %v1304_v61  ;;  %v2217_v2 = vpop.f32.mrb[47].mxu1 }
 0x744   :  { %v1519_v4 = vpop.f32.mrb[56].mxu0 }
 0x745   :  { %v1525_v5 = vadd.f32 %v1519_v4, %v347_v3  ;;  %v2256_v6 = vpop.f32.mrb[57].mxu0  ;;  %v1388_v7 = vpop.f32.mrb[48].mxu1 }
 0x746   :  { %v1432_v8 = vadd.f32 %v1431_v31, %v1388_v7  ;;  %v1522_v10 = vpop.f32.mrb[58].mxu0  ;;  %v2232_v13 = vpop.f32.mrb[49].mxu1 }
 0x747   :  { %2352 = vtanh.f32 %v1525_v5  ;;  %v2257_v15 = vpop.f32.mrb[59].mxu0  ;;  %v1391_v21 = vpop.f32.mrb[50].mxu1 }
 0x748   :  { %v1437_v22 = vadd.f32 %v2650_v38, %v1432_v8  ;;  %v2233_v24 = vpop.f32.mrb[51].mxu1 }
 0x74a   :  { %2354 = vtanh.f32 %v1437_v22 }
 0x751   :  { %v2353_v25 = vpop.eup %2352 }
 0x752   :  { %v1527_v26 = vpack.c.bf16 %v2353_v25, %v2353_v25 }
 0x754   :  { %v2355_v19 = vpop.eup %2354  ;;  %2271 = vmatmul.mubr.msk.bf16.vlgmr.msra.gmra.mrb[60].mxu0 %vm53_vm2, %v1527_v26 }
 0x755   :  { %v1439_v28 = vpack.c.bf16 %v2355_v19, %v2355_v19  ;;  %2283 = vmatpush3.bf16.msra.mxu0 %v2514_v16  ;;  %2286 = vmatprep.mubr.msk.bf16.mxu0 %vm2363_vm3, %v2362_v17 }
 0x756   :  { %2284 = vmatprep.subr.bf16.mxu0 %v2362_v17 }
 0x757   :  { %2247 = vmatmul.mubr.msk.bf16.vlgmr.msra.gmra.mrb[52].mxu1 %vm53_vm2, %v1439_v28 }
 0x758   :  { %2259 = vmatpush3.bf16.msra.mxu1 %v2570_v9  ;;  %2262 = vmatprep.mubr.msk.bf16.mxu1 %vm2363_vm3, %v2362_v17 }
 0x759   :  { %2285 = vmatpush3.bf16.msra.mxu0 %v2528_v20  ;;  %2260 = vmatprep.subr.bf16.mxu1 %v2362_v17 }
 0x75a   :  { %2298 = vmatprep.subr.bf16.mxu0 %v2362_v17 }
 0x75c   :  { %2261 = vmatpush3.bf16.msra.mxu1 %v2582_v12  ;;  %2287 = vmatmul.mubr.msk.bf16.vlgmr.msra.gmra.mrb[64].mxu0 %vm53_vm2, %v1527_v26 }
 0x75d   :  { %2299 = vmatpush3.bf16.msra.mxu0 %v2577_v11  ;;  %2274 = vmatprep.subr.bf16.mxu1 %v2362_v17 }
 0x75e   :  { %2300 = vmatprep.subr.bf16.mxu0 %v2362_v17  ;;  %2302 = vmatprep.mubr.msk.bf16.mxu0 %vm2363_vm3, %v2362_v17 }
 0x75f   :  { %2263 = vmatmul.mubr.msk.bf16.vlgmr.msra.gmra.mrb[56].mxu1 %vm53_vm2, %v1439_v28 }
 0x760   :  { %2275 = vmatpush3.bf16.msra.mxu1 %v2636_v36  ;;  %2278 = vmatprep.mubr.msk.bf16.mxu1 %vm2363_vm3, %v2362_v17 }
 0x761   :  { %2301 = vmatpush3.bf16.msra.mxu0 %v2593_v14  ;;  %2276 = vmatprep.subr.bf16.mxu1 %v2362_v17 }
 0x764   :  { %2277 = vmatpush3.bf16.msra.mxu1 %v2643_v37 }
 0x765   :  { %2290 = vmatprep.subr.bf16.mxu1 %v2362_v17 }
 0x827   :  { %v1605_v16 = vpop.f32.mrb[60].mxu0 }
 0x828   :  { %v2272_v20 = vpop.f32.mrb[61].mxu0 }
 0x829   :  { %v1608_v11 = vpop.f32.mrb[62].mxu0 }
 0x82a   :  { %v2273_v27 = vpop.f32.mrb[63].mxu0  ;;  %v1477_v29 = vpop.f32.mrb[52].mxu1 }
 0x82b   :  { %v1478_v32 = vadd.f32 %v2685_v55, %v1477_v29  ;;  %v2248_v33 = vpop.f32.mrb[53].mxu1 }
 0x82c   :  { %v1480_v34 = vpop.f32.mrb[54].mxu1 }
 0x82d   :  { %1907 = vst [vmem:[%s2915_s13 + $0x28] sm:$0xff] %v1478_v32  ;;  %v2249_v14 = vpop.f32.mrb[55].mxu1 }
 0x82f   :  { %v1693_v39 = vpop.f32.mrb[64].mxu0 }
 0x830   :  { %v1699_v40 = vadd.f32 %v1693_v39, %v350_v35  ;;  %v2288_v41 = vpop.f32.mrb[65].mxu0 }
 0x831   :  { %v1696_v42 = vpop.f32.mrb[66].mxu0 }
 0x832   :  { %2356 = vtanh.f32 %v1699_v40  ;;  %v2289_v43 = vpop.f32.mrb[67].mxu0  ;;  %v1562_v44 = vpop.f32.mrb[56].mxu1 }
 0x833   :  { %v1606_v45 = vadd.f32 %v1605_v16, %v1562_v44  ;;  %v2264_v46 = vpop.f32.mrb[57].mxu1 }
 0x834   :  { %v1565_v47 = vpop.f32.mrb[58].mxu1 }
 0x835   :  { %v1611_v48 = vadd.f32 %v2650_v38, %v1606_v45  ;;  %v2265_v49 = vpop.f32.mrb[59].mxu1 }
 0x837   :  { %2358 = vtanh.f32 %v1611_v48 }
 0x83c   :  { %v2357_v50 = vpop.eup %2356 }
 0x83d   :  { %1833 = vst.msk [vmem:[%s2904_s14] sm:$0xff] %vm53_vm2, %v2357_v50  ;;  %v1701_v18 = vpack.c.bf16 %v2357_v50, %v2357_v50 }
 0x83f   :  { %2303 = vmatmul.mubr.msk.bf16.vlgmr.msra.gmra.mrb[68].mxu0 %vm53_vm2, %v1701_v18 }
 0x841   :  { %v2359_v30 = vpop.eup %2358 }
 0x842   :  { %v1613_v51 = vpack.c.bf16 %v2359_v30, %v2359_v30 }
 0x844   :  { %2279 = vmatmul.mubr.msk.bf16.vlgmr.msra.gmra.mrb[60].mxu1 %vm53_vm2, %v1613_v51 }
 0x845   :  { %2291 = vmatpush3.bf16.msra.mxu1 %v2570_v9  ;;  %2294 = vmatprep.mubr.msk.bf16.mxu1 %vm2363_vm3, %v2362_v17 }
 0x846   :  { %2292 = vmatprep.subr.bf16.mxu1 %v2362_v17 }
 0x849   :  { %2293 = vmatpush3.bf16.msra.mxu1 %v2582_v12 }
 0x84a   :  { %2306 = vmatprep.subr.bf16.mxu1 %v2362_v17 }
 0x84c   :  { %2295 = vmatmul.mubr.msk.bf16.vlgmr.msra.gmra.mrb[64].mxu1 %vm53_vm2, %v1613_v51 }
 0x84d   :  { %2307 = vmatpush3.bf16.msra.mxu1 %v2636_v36  ;;  %2310 = vmatprep.mubr.msk.bf16.mxu1 %vm2363_vm3, %v2362_v17 }
 0x84e   :  { %2308 = vmatprep.subr.bf16.mxu1 %v2362_v17 }
 0x851   :  { %2309 = vmatpush3.bf16.msra.mxu1 %v2643_v37 }
 0x912   :  { %v1779_v9 = vpop.f32.mrb[68].mxu0 }
 0x913   :  { %v2304_v52 = vpop.f32.mrb[69].mxu0 }
 0x914   :  { %v1782_v53 = vpop.f32.mrb[70].mxu0 }
 0x915   :  { %v2305_v54 = vpop.f32.mrb[71].mxu0 }
 0x917   :  { %v1651_v56 = vpop.f32.mrb[60].mxu1 }
 0x918   :  { %v1652_v12 = vadd.f32 %v2685_v55, %v1651_v56  ;;  %v2280_v57 = vpop.f32.mrb[61].mxu1 }
 0x919   :  { %v1654_v58 = vpop.f32.mrb[62].mxu1 }
 0x91a   :  { %1912 = vst [vmem:[%s2915_s13 + $0x30] sm:$0xff] %v1652_v12  ;;  %v2281_v36 = vpop.f32.mrb[63].mxu1 }
 0x91f   :  { %v1736_v23 = vpop.f32.mrb[64].mxu1 }
 0x920   :  { %v1780_v31 = vadd.f32 %v1779_v9, %v1736_v23  ;;  %v2296_v59 = vpop.f32.mrb[65].mxu1 }
 0x921   :  { %v1739_v17 = vpop.f32.mrb[66].mxu1 }
 0x922   :  { %v1785_v37 = vadd.f32 %v2650_v38, %v1780_v31  ;;  %v2297_v60 = vpop.f32.mrb[67].mxu1 }
 0x924   :  { %2360 = vtanh.f32 %v1785_v37 }
 0x92e   :  { %v2361_v61 = vpop.eup %2360 }
 0x92f   :  { %1834 = vst.msk [vmem:[%s2908_s15] sm:$0xff] %vm53_vm2, %v2361_v61  ;;  %v1787_v62 = vpack.c.bf16 %v2361_v61, %v2361_v61 }
 0x931   :  { %2311 = vmatmul.mubr.msk.bf16.vlgmr.msra.gmra.mrb[68].mxu1 %vm53_vm2, %v1787_v62 }
 0xa04   :  { %v1825_v63 = vpop.f32.mrb[68].mxu1 }
 0xa05   :  { %v1826_v0 = vadd.f32 %v2685_v55, %v1825_v63  ;;  %v2312_v1 = vpop.f32.mrb[69].mxu1 }
 0xa06   :  { %v1828_v2 = vpop.f32.mrb[70].mxu1 }
 0xa07   :  { %1917 = vst [vmem:[%s2915_s13 + $0x38] sm:$0xff] %v1826_v0  ;;  %v2313_v38 = vpop.f32.mrb[71].mxu1 }

</bundles_post_ra>
